<compile_context>
chip_gen: v5e
topology: v5e:2x2
jax: 0.10.0
libtpu: 0.0.40
codegen_flags: <defaults>
</compile_context>

<pallas_src>
import numpy as np
import jax
import jax.numpy as jnp
from jax.experimental import pallas as pl
from jax.experimental.pallas import tpu as pltpu

LANE = 128


def _round_up(x, m):
    return (x + m - 1) // m * m


def make_actor_critic_kernel(num_layers: int, n_actions: int, P: int):
    """Kernel over one batch tile of TB states (TB = sublane tile, multiple of 8)."""

    def kernel(x_ref, h0_ref, gru_w_ref, gru_b_ref, head_w_ref, head_b_ref, out_ref):
        f32 = jnp.float32

        # ---- stacked GRU, single time step (seq_len = 1), batched over TB states ----
        layer_in = x_ref[...]                                    # (TB, P)
        new_h = []
        for l in range(num_layers):
            h = h0_ref[l, :, :]                                  # (TB, P)
            xh = jnp.concatenate([layer_in, h], axis=1)          # (TB, 2P)
            g = jnp.dot(xh, gru_w_ref[l, :, :], preferred_element_type=f32)
            g = g + gru_b_ref[pl.ds(l, 1), :]                    # (TB, 4P)
            # gate blocks are 128-lane aligned: r | z | n_ih | n_hh
            r = jax.nn.sigmoid(g[:, 0 * P:1 * P])
            z = jax.nn.sigmoid(g[:, 1 * P:2 * P])
            n = jnp.tanh(g[:, 2 * P:3 * P] + r * g[:, 3 * P:4 * P])
            layer_in = (1.0 - z) * n + z * h                     # new hidden -> next layer input
            new_h.append(layer_in)
        hn_last = layer_in                                       # (TB, P) == hn[-1]

        def head(i, v, relu=True):
            y = jnp.dot(v, head_w_ref[i, :, :], preferred_element_type=f32)
            y = y + head_b_ref[pl.ds(i, 1), :]
            return jax.nn.relu(y) if relu else y

        # ---- actor head ----
        x1 = head(0, hn_last)            # fc1
        x2 = head(1, x1)                 # fc2
        scores = head(2, x2)             # att; lanes >= n_actions are exactly 0

        lane = jax.lax.broadcasted_iota(jnp.int32, scores.shape, 1)
        valid = lane < n_actions
        logits = jnp.where(valid, scores, jnp.float32(-1e30))
        m = jnp.max(logits, axis=-1, keepdims=True)
        e = jnp.where(valid, jnp.exp(scores - m), 0.0)
        denom = jnp.sum(e, axis=-1, keepdims=True)
        probs = e * pl.reciprocal(denom, approx=True)

        # ---- critic head (hidden_out.detach() -> same values in forward) ----
        v1 = head(3, hn_last)            # pre_val
        val = head(4, v1, relu=False)    # val; lane 0 holds the scalar value

        # single lane-dense output slab
        out_ref[0, :, :] = scores
        out_ref[1, :, :] = probs
        out_ref[2, :, :] = val
        for l in range(num_layers):
            out_ref[3 + l, :, :] = new_h[l]

    return kernel


def init_raw_params(key, input_size, hidden_size, num_layers, n_actions):
    """PyTorch-layout parameters (Linear weight: (out, in)), U(-1/sqrt(fan), 1/sqrt(fan))."""
    H = hidden_size
    keys = iter(jax.random.split(key, 4 * num_layers + 10))

    def u(k, shape, fan):
        b = 1.0 / float(np.sqrt(fan))
        return jax.random.uniform(k, shape, jnp.float32, -b, b)

    gru = []
    for l in range(num_layers):
        in_l = input_size if l == 0 else H
        gru.append(dict(
            w_ih=u(next(keys), (3 * H, in_l), H),   # gate order r | z | n (torch)
            w_hh=u(next(keys), (3 * H, H), H),
            b_ih=u(next(keys), (3 * H,), H),
            b_hh=u(next(keys), (3 * H,), H)))
    raw = {"gru": gru}
    raw["fc1_w"] = u(next(keys), (2 * H, H), H);     raw["fc1_b"] = u(next(keys), (2 * H,), H)
    raw["fc2_w"] = u(next(keys), (H, 2 * H), 2 * H); raw["fc2_b"] = u(next(keys), (H,), 2 * H)
    raw["att_w"] = u(next(keys), (n_actions, H), H); raw["att_b"] = u(next(keys), (n_actions,), H)
    raw["pre_w"] = u(next(keys), (H, H), H);         raw["pre_b"] = u(next(keys), (H,), H)
    raw["val_w"] = u(next(keys), (1, H), H);         raw["val_b"] = u(next(keys), (1,), H)
    return raw


def pack_params(raw, *, hidden_size, num_layers, P):
    """Pack into lane-aligned slabs: gate columns start at multiples of 128 lanes."""
    H = hidden_size
    gru_w = jnp.zeros((num_layers, 2 * P, 4 * P), jnp.float32)
    gru_b = jnp.zeros((num_layers, 4 * P), jnp.float32)
    for l in range(num_layers):
        g = raw["gru"][l]
        w_ih = g["w_ih"].T          # (in_l, 3H)
        w_hh = g["w_hh"].T          # (H, 3H)
        in_l = w_ih.shape[0]
        # lane blocks: 0 = r (ih+hh), 1 = z (ih+hh), 2 = n_ih, 3 = n_hh
        gru_w = gru_w.at[l, :in_l, 0 * P:0 * P + H].set(w_ih[:, 0 * H:1 * H])
        gru_w = gru_w.at[l, :in_l, 1 * P:1 * P + H].set(w_ih[:, 1 * H:2 * H])
        gru_w = gru_w.at[l, :in_l, 2 * P:2 * P + H].set(w_ih[:, 2 * H:3 * H])
        gru_w = gru_w.at[l, P:P + H, 0 * P:0 * P + H].set(w_hh[:, 0 * H:1 * H])
        gru_w = gru_w.at[l, P:P + H, 1 * P:1 * P + H].set(w_hh[:, 1 * H:2 * H])
        gru_w = gru_w.at[l, P:P + H, 3 * P:3 * P + H].set(w_hh[:, 2 * H:3 * H])
        gru_b = gru_b.at[l, 0 * P:0 * P + H].set(g["b_ih"][0 * H:1 * H] + g["b_hh"][0 * H:1 * H])
        gru_b = gru_b.at[l, 1 * P:1 * P + H].set(g["b_ih"][1 * H:2 * H] + g["b_hh"][1 * H:2 * H])
        gru_b = gru_b.at[l, 2 * P:2 * P + H].set(g["b_ih"][2 * H:3 * H])
        gru_b = gru_b.at[l, 3 * P:3 * P + H].set(g["b_hh"][2 * H:3 * H])

    head_w = jnp.zeros((5, P, P), jnp.float32)
    head_b = jnp.zeros((5, P), jnp.float32)
    for i, name in enumerate(["fc1", "fc2", "att", "pre", "val"]):
        w = raw[name + "_w"].T      # (in, out)
        b = raw[name + "_b"]
        head_w = head_w.at[i, :w.shape[0], :w.shape[1]].set(w)
        head_b = head_b.at[i, :b.shape[0]].set(b)
    return {"gru_w": gru_w, "gru_b": gru_b, "head_w": head_w, "head_b": head_b}


def actor_critic_forward_batched(packed, states, h0, sample_key, *,
                                 input_size, hidden_size, num_layers, n_actions,
                                 batch_tile=8):
    """B independent forwards (each its own h0) in one pallas_call."""
    P = packed["head_w"].shape[-1]
    B = states.shape[0]
    BP = _round_up(max(B, 1), batch_tile)

    x = jnp.zeros((BP, P), jnp.float32)
    x = x.at[:B, :input_size].set(jnp.asarray(states, jnp.float32).reshape(B, input_size))
    h0p = jnp.zeros((num_layers, BP, P), jnp.float32)
    h0p = h0p.at[:, :B, :hidden_size].set(
        jnp.asarray(h0, jnp.float32).reshape(num_layers, B, hidden_size))

    OUT_SLOTS = 3 + num_layers
    kernel = make_actor_critic_kernel(num_layers, n_actions, P)

    out = pl.pallas_call(
        kernel,
        out_shape=jax.ShapeDtypeStruct((OUT_SLOTS, BP, P), jnp.float32),
        grid=(BP // batch_tile,),
        in_specs=[
            pl.BlockSpec((batch_tile, P), lambda i: (i, 0)),                 # per-tile states
            pl.BlockSpec((num_layers, batch_tile, P), lambda i: (0, i, 0)),  # per-tile h0
            pl.BlockSpec((num_layers, 2 * P, 4 * P), lambda i: (0, 0, 0)),   # resident GRU weights
            pl.BlockSpec((num_layers, 4 * P), lambda i: (0, 0)),             # resident GRU biases
            pl.BlockSpec((5, P, P), lambda i: (0, 0, 0)),                    # resident head weights
            pl.BlockSpec((5, P), lambda i: (0, 0)),                          # resident head biases
        ],
        out_specs=pl.BlockSpec((OUT_SLOTS, batch_tile, P), lambda i: (0, i, 0)),
        compiler_params=pltpu.CompilerParams(dimension_semantics=("parallel",)),
    )(x, h0p, packed["gru_w"], packed["gru_b"], packed["head_w"], packed["head_b"])

    scores = out[0, :B, :n_actions]                 # (B, n_actions)
    probs = out[1, :B, :n_actions]                  # (B, n_actions)
    val = out[2, :B, 0:1]                           # (B, 1)
    hn = out[3:3 + num_layers, :B, :hidden_size]    # (num_layers, B, H)
    # torch.multinomial(softmax(scores), 1) == categorical with `scores` as logits.
    index = jax.random.categorical(sample_key, scores, axis=-1)   # (B,)
    return index, scores, probs, val, hn


def actor_critic_forward(packed, state, h0, sample_key, *,
                         input_size, hidden_size, num_layers, n_actions):
    """Single-state path matching the PyTorch forward(): returns (index, scores, val, hn)."""
    states = jnp.asarray(state, jnp.float32).reshape(1, input_size)
    h0b = jnp.asarray(h0, jnp.float32).reshape(num_layers, 1, hidden_size)
    index, scores, probs, val, hn = actor_critic_forward_batched(
        packed, states, h0b, sample_key,
        input_size=input_size, hidden_size=hidden_size,
        num_layers=num_layers, n_actions=n_actions)
    return index[:1], scores[0], val[0:1, :], hn[:, 0, :]


def reference_forward(raw, x_flat, h0, *, hidden_size, num_layers):
    """Pure-JAX reference of the PyTorch module for one state."""
    H = hidden_size
    layer_in = x_flat[None, :].astype(jnp.float32)
    hn = []
    for l in range(num_layers):
        g = raw["gru"][l]
        h = h0[l][None, :]
        gi = layer_in @ g["w_ih"].T + g["b_ih"][None, :]
        gh = h @ g["w_hh"].T + g["b_hh"][None, :]
        r = jax.nn.sigmoid(gi[:, :H] + gh[:, :H])
        z = jax.nn.sigmoid(gi[:, H:2 * H] + gh[:, H:2 * H])
        n = jnp.tanh(gi[:, 2 * H:] + r * gh[:, 2 * H:])
        layer_in = (1.0 - z) * n + z * h
        hn.append(layer_in[0])
    hlast = layer_in
    x1 = jax.nn.relu(hlast @ raw["fc1_w"].T + raw["fc1_b"][None, :])
    x2 = jax.nn.relu(x1 @ raw["fc2_w"].T + raw["fc2_b"][None, :])
    scores = jax.nn.relu(x2 @ raw["att_w"].T + raw["att_b"][None, :])[0]
    probs = jax.nn.softmax(scores)
    v = jax.nn.relu(hlast @ raw["pre_w"].T + raw["pre_b"][None, :])
    val = v @ raw["val_w"].T + raw["val_b"][None, :]
    return scores, probs, val, jnp.stack(hn)


if __name__ == "__main__":
    input_size = 64          # flattened 8x8 state
    hidden_size = 32
    num_layers = 2
    n_actions = 8
    batch = 16               # 16 independent env states in one launch (two 8-row tiles)

    P = _round_up(max(input_size, 2 * hidden_size, n_actions, 1), LANE)

    root = jax.random.PRNGKey(0)
    k_params, k_state, k_h0, k_sample = jax.random.split(root, 4)

    raw = init_raw_params(k_params, input_size, hidden_size, num_layers, n_actions)
    packed = pack_params(raw, hidden_size=hidden_size, num_layers=num_layers, P=P)

    states = jax.random.normal(k_state, (batch, 8, 8), jnp.float32)                 # synthetic boards
    h0 = jax.random.uniform(k_h0, (num_layers, batch, hidden_size), jnp.float32)    # T.rand analogue

    index, scores, probs, val, hn = actor_critic_forward_batched(
        packed, states, h0, k_sample,
        input_size=input_size, hidden_size=hidden_size,
        num_layers=num_layers, n_actions=n_actions)
    jax.block_until_ready((index, scores, probs, val, hn))

    assert index.shape == (batch,)
    assert scores.shape == (batch, n_actions)
    assert val.shape == (batch, 1)
    assert hn.shape == (num_layers, batch, hidden_size)

    # Correctness: compare every sample against the pure-JAX reference.
    for b in range(batch):
        r_scores, r_probs, r_val, r_hn = reference_forward(
            raw, states[b].reshape(-1), h0[:, b, :],
            hidden_size=hidden_size, num_layers=num_layers)
        np.testing.assert_allclose(np.asarray(scores[b]), np.asarray(r_scores), rtol=1e-4, atol=1e-5)
        np.testing.assert_allclose(np.asarray(val[b]), np.asarray(r_val[0]), rtol=1e-4, atol=1e-5)
        np.testing.assert_allclose(np.asarray(hn[:, b, :]), np.asarray(r_hn), rtol=1e-4, atol=1e-5)
        np.testing.assert_allclose(np.asarray(probs[b]), np.asarray(r_probs), rtol=2e-2, atol=2e-3)

    # Single-state path (matches the PyTorch forward() signature / shapes).
    s_index, s_scores, s_val, s_hn = actor_critic_forward(
        packed, states[0], h0[:, 0:1, :], k_sample,
        input_size=input_size, hidden_size=hidden_size,
        num_layers=num_layers, n_actions=n_actions)
    jax.block_until_ready((s_index, s_scores, s_val, s_hn))
    assert s_index.shape == (1,)
    assert s_scores.shape == (n_actions,)
    assert s_val.shape == (1, 1)
    assert s_hn.shape == (num_layers, hidden_size)

    print("KERNEL_OK")
</pallas_src>

<mosaic_0001>
module attributes {stable_mosaic.version = 11 : i64} {
  func.func @kernel(%arg0: i32, %arg1: memref<8x128xf32, #tpu.memory_space<vmem>>, %arg2: memref<2x8x128xf32, #tpu.memory_space<vmem>>, %arg3: memref<2x256x512xf32, #tpu.memory_space<vmem>>, %arg4: memref<2x512xf32, #tpu.memory_space<vmem>>, %arg5: memref<5x128x128xf32, #tpu.memory_space<vmem>>, %arg6: memref<5x128xf32, #tpu.memory_space<vmem>>, %arg7: memref<5x8x128xf32, #tpu.memory_space<vmem>>) attributes {dimension_semantics = [#tpu.dimension_semantics<parallel>], iteration_bounds = array<i64: 2>, scalar_prefetch = 0 : i64, scratch_operands = 0 : i64, tpu.core_type = #tpu.core_type<tc>, window_params = [{transform_indices = @transform_0, window_bounds = array<i64: 8, 128>}, {transform_indices = @transform_1, window_bounds = array<i64: 2, 8, 128>}, {pipeline_mode = #tpu.pipeline_mode<synchronous>, transform_indices = @transform_2, window_bounds = array<i64: 2, 256, 512>}, {pipeline_mode = #tpu.pipeline_mode<synchronous>, transform_indices = @transform_3, window_bounds = array<i64: 2, 512>}, {pipeline_mode = #tpu.pipeline_mode<synchronous>, transform_indices = @transform_4, window_bounds = array<i64: 5, 128, 128>}, {pipeline_mode = #tpu.pipeline_mode<synchronous>, transform_indices = @transform_5, window_bounds = array<i64: 5, 128>}, {transform_indices = @transform_6, window_bounds = array<i64: 5, 8, 128>}]} {
    %c0 = arith.constant 0 : index
    %c0_0 = arith.constant 0 : index
    %0 = vector.load %arg1[%c0, %c0_0] : memref<8x128xf32, #tpu.memory_space<vmem>>, vector<8x128xf32>
    %c0_1 = arith.constant 0 : index
    %c0_2 = arith.constant 0 : index
    %c0_3 = arith.constant 0 : index
    %1 = vector.load %arg2[%c0_1, %c0_2, %c0_3] : memref<2x8x128xf32, #tpu.memory_space<vmem>>, vector<1x8x128xf32>
    %2 = vector.shape_cast %1 : vector<1x8x128xf32> to vector<8x128xf32>
    %3 = tpu.concatenate %0, %2 in 1 : vector<8x128xf32>, vector<8x128xf32> -> vector<8x256xf32>
    %c0_4 = arith.constant 0 : index
    %c0_5 = arith.constant 0 : index
    %c0_6 = arith.constant 0 : index
    %4 = vector.load %arg3[%c0_4, %c0_5, %c0_6] : memref<2x256x512xf32, #tpu.memory_space<vmem>>, vector<1x256x512xf32>
    %5 = vector.shape_cast %4 : vector<1x256x512xf32> to vector<256x512xf32>
    %cst = arith.constant dense<0.000000e+00> : vector<8x512xf32>
    %6 = tpu.matmul %3, %5, %cst {dimension_numbers = #tpu.dot_dimension_numbers<[1], [0], [0], [1], [0, 0, 1, 1], [], []>} : vector<8x256xf32>, vector<256x512xf32>, vector<8x512xf32> -> vector<8x512xf32>
    %c0_7 = arith.constant 0 : index
    %c0_8 = arith.constant 0 : index
    %7 = vector.load %arg4[%c0_7, %c0_8] : memref<2x512xf32, #tpu.memory_space<vmem>>, vector<1x512xf32>
    %8 = vector.broadcast %7 : vector<1x512xf32> to vector<8x512xf32>
    %9 = arith.addf %6, %8 : vector<8x512xf32>
    %10 = vector.extract_strided_slice %9 {offsets = [0, 0], sizes = [8, 128], strides = [1, 1]} : vector<8x512xf32> to vector<8x128xf32>
    %11 = arith.negf %10 : vector<8x128xf32>
    %12 = math.exp %11 : vector<8x128xf32>
    %cst_9 = arith.constant 1.000000e+00 : f32
    %13 = vector.broadcast %cst_9 : f32 to vector<8x128xf32>
    %14 = arith.addf %13, %12 : vector<8x128xf32>
    %15 = arith.divf %13, %14 : vector<8x128xf32>
    %16 = vector.extract_strided_slice %9 {offsets = [0, 128], sizes = [8, 128], strides = [1, 1]} : vector<8x512xf32> to vector<8x128xf32>
    %17 = arith.negf %16 : vector<8x128xf32>
    %18 = math.exp %17 : vector<8x128xf32>
    %cst_10 = arith.constant 1.000000e+00 : f32
    %19 = vector.broadcast %cst_10 : f32 to vector<8x128xf32>
    %20 = arith.addf %19, %18 : vector<8x128xf32>
    %21 = arith.divf %19, %20 : vector<8x128xf32>
    %22 = vector.extract_strided_slice %9 {offsets = [0, 256], sizes = [8, 128], strides = [1, 1]} : vector<8x512xf32> to vector<8x128xf32>
    %23 = vector.extract_strided_slice %9 {offsets = [0, 384], sizes = [8, 128], strides = [1, 1]} : vector<8x512xf32> to vector<8x128xf32>
    %24 = arith.mulf %15, %23 : vector<8x128xf32>
    %25 = arith.addf %22, %24 : vector<8x128xf32>
    %26 = math.tanh %25 : vector<8x128xf32>
    %cst_11 = arith.constant 1.000000e+00 : f32
    %27 = vector.broadcast %cst_11 : f32 to vector<8x128xf32>
    %28 = arith.subf %27, %21 : vector<8x128xf32>
    %29 = arith.mulf %28, %26 : vector<8x128xf32>
    %30 = arith.mulf %21, %2 : vector<8x128xf32>
    %31 = arith.addf %29, %30 : vector<8x128xf32>
    %c1 = arith.constant 1 : index
    %c0_12 = arith.constant 0 : index
    %c0_13 = arith.constant 0 : index
    %32 = vector.load %arg2[%c1, %c0_12, %c0_13] : memref<2x8x128xf32, #tpu.memory_space<vmem>>, vector<1x8x128xf32>
    %33 = vector.shape_cast %32 : vector<1x8x128xf32> to vector<8x128xf32>
    %34 = tpu.concatenate %31, %33 in 1 : vector<8x128xf32>, vector<8x128xf32> -> vector<8x256xf32>
    %c1_14 = arith.constant 1 : index
    %c0_15 = arith.constant 0 : index
    %c0_16 = arith.constant 0 : index
    %35 = vector.load %arg3[%c1_14, %c0_15, %c0_16] : memref<2x256x512xf32, #tpu.memory_space<vmem>>, vector<1x256x512xf32>
    %36 = vector.shape_cast %35 : vector<1x256x512xf32> to vector<256x512xf32>
    %cst_17 = arith.constant dense<0.000000e+00> : vector<8x512xf32>
    %37 = tpu.matmul %34, %36, %cst_17 {dimension_numbers = #tpu.dot_dimension_numbers<[1], [0], [0], [1], [0, 0, 1, 1], [], []>} : vector<8x256xf32>, vector<256x512xf32>, vector<8x512xf32> -> vector<8x512xf32>
    %c1_18 = arith.constant 1 : index
    %c0_19 = arith.constant 0 : index
    %38 = vector.load %arg4[%c1_18, %c0_19] : memref<2x512xf32, #tpu.memory_space<vmem>>, vector<1x512xf32>
    %39 = vector.broadcast %38 : vector<1x512xf32> to vector<8x512xf32>
    %40 = arith.addf %37, %39 : vector<8x512xf32>
    %41 = vector.extract_strided_slice %40 {offsets = [0, 0], sizes = [8, 128], strides = [1, 1]} : vector<8x512xf32> to vector<8x128xf32>
    %42 = arith.negf %41 : vector<8x128xf32>
    %43 = math.exp %42 : vector<8x128xf32>
    %cst_20 = arith.constant 1.000000e+00 : f32
    %44 = vector.broadcast %cst_20 : f32 to vector<8x128xf32>
    %45 = arith.addf %44, %43 : vector<8x128xf32>
    %46 = arith.divf %44, %45 : vector<8x128xf32>
    %47 = vector.extract_strided_slice %40 {offsets = [0, 128], sizes = [8, 128], strides = [1, 1]} : vector<8x512xf32> to vector<8x128xf32>
    %48 = arith.negf %47 : vector<8x128xf32>
    %49 = math.exp %48 : vector<8x128xf32>
    %cst_21 = arith.constant 1.000000e+00 : f32
    %50 = vector.broadcast %cst_21 : f32 to vector<8x128xf32>
    %51 = arith.addf %50, %49 : vector<8x128xf32>
    %52 = arith.divf %50, %51 : vector<8x128xf32>
    %53 = vector.extract_strided_slice %40 {offsets = [0, 256], sizes = [8, 128], strides = [1, 1]} : vector<8x512xf32> to vector<8x128xf32>
    %54 = vector.extract_strided_slice %40 {offsets = [0, 384], sizes = [8, 128], strides = [1, 1]} : vector<8x512xf32> to vector<8x128xf32>
    %55 = arith.mulf %46, %54 : vector<8x128xf32>
    %56 = arith.addf %53, %55 : vector<8x128xf32>
    %57 = math.tanh %56 : vector<8x128xf32>
    %cst_22 = arith.constant 1.000000e+00 : f32
    %58 = vector.broadcast %cst_22 : f32 to vector<8x128xf32>
    %59 = arith.subf %58, %52 : vector<8x128xf32>
    %60 = arith.mulf %59, %57 : vector<8x128xf32>
    %61 = arith.mulf %52, %33 : vector<8x128xf32>
    %62 = arith.addf %60, %61 : vector<8x128xf32>
    %c0_23 = arith.constant 0 : index
    %c0_24 = arith.constant 0 : index
    %c0_25 = arith.constant 0 : index
    %63 = vector.load %arg5[%c0_23, %c0_24, %c0_25] : memref<5x128x128xf32, #tpu.memory_space<vmem>>, vector<1x128x128xf32>
    %64 = vector.shape_cast %63 : vector<1x128x128xf32> to vector<128x128xf32>
    %cst_26 = arith.constant dense<0.000000e+00> : vector<8x128xf32>
    %65 = tpu.matmul %62, %64, %cst_26 {dimension_numbers = #tpu.dot_dimension_numbers<[1], [0], [0], [1], [0, 0, 1, 1], [], []>} : vector<8x128xf32>, vector<128x128xf32>, vector<8x128xf32> -> vector<8x128xf32>
    %c0_27 = arith.constant 0 : index
    %c0_28 = arith.constant 0 : index
    %66 = vector.load %arg6[%c0_27, %c0_28] : memref<5x128xf32, #tpu.memory_space<vmem>>, vector<1x128xf32>
    %67 = vector.broadcast %66 : vector<1x128xf32> to vector<8x128xf32>
    %68 = arith.addf %65, %67 : vector<8x128xf32>
    %cst_29 = arith.constant 0.000000e+00 : f32
    %69 = vector.broadcast %cst_29 : f32 to vector<8x128xf32>
    %70 = arith.maximumf %68, %69 : vector<8x128xf32>
    %c1_30 = arith.constant 1 : index
    %c0_31 = arith.constant 0 : index
    %c0_32 = arith.constant 0 : index
    %71 = vector.load %arg5[%c1_30, %c0_31, %c0_32] : memref<5x128x128xf32, #tpu.memory_space<vmem>>, vector<1x128x128xf32>
    %72 = vector.shape_cast %71 : vector<1x128x128xf32> to vector<128x128xf32>
    %cst_33 = arith.constant dense<0.000000e+00> : vector<8x128xf32>
    %73 = tpu.matmul %70, %72, %cst_33 {dimension_numbers = #tpu.dot_dimension_numbers<[1], [0], [0], [1], [0, 0, 1, 1], [], []>} : vector<8x128xf32>, vector<128x128xf32>, vector<8x128xf32> -> vector<8x128xf32>
    %c1_34 = arith.constant 1 : index
    %c0_35 = arith.constant 0 : index
    %74 = vector.load %arg6[%c1_34, %c0_35] : memref<5x128xf32, #tpu.memory_space<vmem>>, vector<1x128xf32>
    %75 = vector.broadcast %74 : vector<1x128xf32> to vector<8x128xf32>
    %76 = arith.addf %73, %75 : vector<8x128xf32>
    %cst_36 = arith.constant 0.000000e+00 : f32
    %77 = vector.broadcast %cst_36 : f32 to vector<8x128xf32>
    %78 = arith.maximumf %76, %77 : vector<8x128xf32>
    %c2 = arith.constant 2 : index
    %c0_37 = arith.constant 0 : index
    %c0_38 = arith.constant 0 : index
    %79 = vector.load %arg5[%c2, %c0_37, %c0_38] : memref<5x128x128xf32, #tpu.memory_space<vmem>>, vector<1x128x128xf32>
    %80 = vector.shape_cast %79 : vector<1x128x128xf32> to vector<128x128xf32>
    %cst_39 = arith.constant dense<0.000000e+00> : vector<8x128xf32>
    %81 = tpu.matmul %78, %80, %cst_39 {dimension_numbers = #tpu.dot_dimension_numbers<[1], [0], [0], [1], [0, 0, 1, 1], [], []>} : vector<8x128xf32>, vector<128x128xf32>, vector<8x128xf32> -> vector<8x128xf32>
    %c2_40 = arith.constant 2 : index
    %c0_41 = arith.constant 0 : index
    %82 = vector.load %arg6[%c2_40, %c0_41] : memref<5x128xf32, #tpu.memory_space<vmem>>, vector<1x128xf32>
    %83 = vector.broadcast %82 : vector<1x128xf32> to vector<8x128xf32>
    %84 = arith.addf %81, %83 : vector<8x128xf32>
    %cst_42 = arith.constant 0.000000e+00 : f32
    %85 = vector.broadcast %cst_42 : f32 to vector<8x128xf32>
    %86 = arith.maximumf %84, %85 : vector<8x128xf32>
    %87 = tpu.iota {dimensions = array<i32: 1>} : vector<8x128xi32>
    %c8_i32 = arith.constant 8 : i32
    %88 = vector.broadcast %c8_i32 : i32 to vector<8x128xi32>
    %89 = arith.cmpi slt, %87, %88 : vector<8x128xi32>
    %cst_43 = arith.constant -1.000000e+30 : f32
    %90 = vector.broadcast %cst_43 : f32 to vector<8x128xf32>
    %91 = arith.select %89, %86, %90 : vector<8x128xi1>, vector<8x128xf32>
    %cst_44 = arith.constant dense<0xFF800000> : vector<8xf32>
    %92 = vector.multi_reduction <maximumf>, %91, %cst_44 [1] : vector<8x128xf32> to vector<8xf32>
    %93 = vector.shape_cast %92 : vector<8xf32> to vector<8x1xf32>
    %94 = vector.broadcast %93 : vector<8x1xf32> to vector<8x128xf32>
    %95 = arith.subf %86, %94 : vector<8x128xf32>
    %96 = math.exp %95 : vector<8x128xf32>
    %cst_45 = arith.constant 0.000000e+00 : f32
    %97 = vector.broadcast %cst_45 : f32 to vector<8x128xf32>
    %98 = arith.select %89, %96, %97 : vector<8x128xi1>, vector<8x128xf32>
    %cst_46 = arith.constant dense<0.000000e+00> : vector<8xf32>
    %99 = vector.multi_reduction <add>, %98, %cst_46 [1] : vector<8x128xf32> to vector<8xf32>
    %100 = vector.shape_cast %99 : vector<8xf32> to vector<8x1xf32>
    %101 = tpu.reciprocal %100 {approx = true} : vector<8x1xf32> -> vector<8x1xf32>
    %102 = vector.broadcast %101 : vector<8x1xf32> to vector<8x128xf32>
    %103 = arith.mulf %98, %102 : vector<8x128xf32>
    %c3 = arith.constant 3 : index
    %c0_47 = arith.constant 0 : index
    %c0_48 = arith.constant 0 : index
    %104 = vector.load %arg5[%c3, %c0_47, %c0_48] : memref<5x128x128xf32, #tpu.memory_space<vmem>>, vector<1x128x128xf32>
    %105 = vector.shape_cast %104 : vector<1x128x128xf32> to vector<128x128xf32>
    %cst_49 = arith.constant dense<0.000000e+00> : vector<8x128xf32>
    %106 = tpu.matmul %62, %105, %cst_49 {dimension_numbers = #tpu.dot_dimension_numbers<[1], [0], [0], [1], [0, 0, 1, 1], [], []>} : vector<8x128xf32>, vector<128x128xf32>, vector<8x128xf32> -> vector<8x128xf32>
    %c3_50 = arith.constant 3 : index
    %c0_51 = arith.constant 0 : index
    %107 = vector.load %arg6[%c3_50, %c0_51] : memref<5x128xf32, #tpu.memory_space<vmem>>, vector<1x128xf32>
    %108 = vector.broadcast %107 : vector<1x128xf32> to vector<8x128xf32>
    %109 = arith.addf %106, %108 : vector<8x128xf32>
    %cst_52 = arith.constant 0.000000e+00 : f32
    %110 = vector.broadcast %cst_52 : f32 to vector<8x128xf32>
    %111 = arith.maximumf %109, %110 : vector<8x128xf32>
    %c4 = arith.constant 4 : index
    %c0_53 = arith.constant 0 : index
    %c0_54 = arith.constant 0 : index
    %112 = vector.load %arg5[%c4, %c0_53, %c0_54] : memref<5x128x128xf32, #tpu.memory_space<vmem>>, vector<1x128x128xf32>
    %113 = vector.shape_cast %112 : vector<1x128x128xf32> to vector<128x128xf32>
    %cst_55 = arith.constant dense<0.000000e+00> : vector<8x128xf32>
    %114 = tpu.matmul %111, %113, %cst_55 {dimension_numbers = #tpu.dot_dimension_numbers<[1], [0], [0], [1], [0, 0, 1, 1], [], []>} : vector<8x128xf32>, vector<128x128xf32>, vector<8x128xf32> -> vector<8x128xf32>
    %c4_56 = arith.constant 4 : index
    %c0_57 = arith.constant 0 : index
    %115 = vector.load %arg6[%c4_56, %c0_57] : memref<5x128xf32, #tpu.memory_space<vmem>>, vector<1x128xf32>
    %116 = vector.broadcast %115 : vector<1x128xf32> to vector<8x128xf32>
    %117 = arith.addf %114, %116 : vector<8x128xf32>
    %c0_58 = arith.constant 0 : index
    %c0_59 = arith.constant 0 : index
    %c0_60 = arith.constant 0 : index
    %118 = vector.load %arg7[%c0_58, %c0_59, %c0_60] : memref<5x8x128xf32, #tpu.memory_space<vmem>>, vector<1x8x128xf32>
    %119 = vector.shape_cast %118 : vector<1x8x128xf32> to vector<8x128xf32>
    %120 = vector.shape_cast %86 : vector<8x128xf32> to vector<1x8x128xf32>
    tpu.vector_store %arg7[%c0_58, %c0_59, %c0_60], %120 {strides = array<i32>} : memref<5x8x128xf32, #tpu.memory_space<vmem>>, vector<1x8x128xf32>,
    %c1_61 = arith.constant 1 : index
    %c0_62 = arith.constant 0 : index
    %c0_63 = arith.constant 0 : index
    %121 = vector.load %arg7[%c1_61, %c0_62, %c0_63] : memref<5x8x128xf32, #tpu.memory_space<vmem>>, vector<1x8x128xf32>
    %122 = vector.shape_cast %121 : vector<1x8x128xf32> to vector<8x128xf32>
    %123 = vector.shape_cast %103 : vector<8x128xf32> to vector<1x8x128xf32>
    tpu.vector_store %arg7[%c1_61, %c0_62, %c0_63], %123 {strides = array<i32>} : memref<5x8x128xf32, #tpu.memory_space<vmem>>, vector<1x8x128xf32>,
    %c2_64 = arith.constant 2 : index
    %c0_65 = arith.constant 0 : index
    %c0_66 = arith.constant 0 : index
    %124 = vector.load %arg7[%c2_64, %c0_65, %c0_66] : memref<5x8x128xf32, #tpu.memory_space<vmem>>, vector<1x8x128xf32>
    %125 = vector.shape_cast %124 : vector<1x8x128xf32> to vector<8x128xf32>
    %126 = vector.shape_cast %117 : vector<8x128xf32> to vector<1x8x128xf32>
    tpu.vector_store %arg7[%c2_64, %c0_65, %c0_66], %126 {strides = array<i32>} : memref<5x8x128xf32, #tpu.memory_space<vmem>>, vector<1x8x128xf32>,
    %c3_67 = arith.constant 3 : index
    %c0_68 = arith.constant 0 : index
    %c0_69 = arith.constant 0 : index
    %127 = vector.load %arg7[%c3_67, %c0_68, %c0_69] : memref<5x8x128xf32, #tpu.memory_space<vmem>>, vector<1x8x128xf32>
    %128 = vector.shape_cast %127 : vector<1x8x128xf32> to vector<8x128xf32>
    %129 = vector.shape_cast %31 : vector<8x128xf32> to vector<1x8x128xf32>
    tpu.vector_store %arg7[%c3_67, %c0_68, %c0_69], %129 {strides = array<i32>} : memref<5x8x128xf32, #tpu.memory_space<vmem>>, vector<1x8x128xf32>,
    %c4_70 = arith.constant 4 : index
    %c0_71 = arith.constant 0 : index
    %c0_72 = arith.constant 0 : index
    %130 = vector.load %arg7[%c4_70, %c0_71, %c0_72] : memref<5x8x128xf32, #tpu.memory_space<vmem>>, vector<1x8x128xf32>
    %131 = vector.shape_cast %130 : vector<1x8x128xf32> to vector<8x128xf32>
    %132 = vector.shape_cast %62 : vector<8x128xf32> to vector<1x8x128xf32>
    tpu.vector_store %arg7[%c4_70, %c0_71, %c0_72], %132 {strides = array<i32>} : memref<5x8x128xf32, #tpu.memory_space<vmem>>, vector<1x8x128xf32>,
    return
  }
  func.func @transform_0(%arg0: i32) -> (i32, i32) {
    %c0_i32 = arith.constant 0 : i32
    %c0_i32_0 = arith.constant 0 : i32
    return %arg0, %c0_i32 : i32, i32
  }
  func.func @transform_1(%arg0: i32) -> (i32, i32, i32) {
    %c0_i32 = arith.constant 0 : i32
    %c0_i32_0 = arith.constant 0 : i32
    %c0_i32_1 = arith.constant 0 : i32
    return %c0_i32, %arg0, %c0_i32_0 : i32, i32, i32
  }
  func.func @transform_2(%arg0: i32) -> (i32, i32, i32) {
    %c0_i32 = arith.constant 0 : i32
    %c0_i32_0 = arith.constant 0 : i32
    %c0_i32_1 = arith.constant 0 : i32
    %c0_i32_2 = arith.constant 0 : i32
    return %c0_i32, %c0_i32_0, %c0_i32_1 : i32, i32, i32
  }
  func.func @transform_3(%arg0: i32) -> (i32, i32) {
    %c0_i32 = arith.constant 0 : i32
    %c0_i32_0 = arith.constant 0 : i32
    %c0_i32_1 = arith.constant 0 : i32
    return %c0_i32, %c0_i32_0 : i32, i32
  }
  func.func @transform_4(%arg0: i32) -> (i32, i32, i32) {
    %c0_i32 = arith.constant 0 : i32
    %c0_i32_0 = arith.constant 0 : i32
    %c0_i32_1 = arith.constant 0 : i32
    %c0_i32_2 = arith.constant 0 : i32
    return %c0_i32, %c0_i32_0, %c0_i32_1 : i32, i32, i32
  }
  func.func @transform_5(%arg0: i32) -> (i32, i32) {
    %c0_i32 = arith.constant 0 : i32
    %c0_i32_0 = arith.constant 0 : i32
    %c0_i32_1 = arith.constant 0 : i32
    return %c0_i32, %c0_i32_0 : i32, i32
  }
  func.func @transform_6(%arg0: i32) -> (i32, i32, i32) {
    %c0_i32 = arith.constant 0 : i32
    %c0_i32_0 = arith.constant 0 : i32
    %c0_i32_1 = arith.constant 0 : i32
    return %c0_i32, %arg0, %c0_i32_0 : i32, i32, i32
  }
}

</mosaic_0001>

<bundles_post_ra>
// kernel: tpu_custom_call.1
= control target key start
LH: loop header
LB: loop body
LE: loop exit
PB: predicated region body
PF: predicated region fallthrough
CT: control target
= control target key end

     0   :  { %s2201_s0 = inlined_call_operand.hbm [shape: f32[16,128], index: 0, kind: input, shape index: {}]   ;;  %s2202_s1 = inlined_call_operand.hbm [shape: f32[2,16,128], index: 1, kind: input, shape index: {}]   ;;  %s2203_s2 = inlined_call_operand.hbm [shape: f32[2,256,512], index: 2, kind: input, shape index: {}]   ;;  %s2204_s3 = inlined_call_operand.hbm [shape: f32[2,512], index: 3, kind: input, shape index: {}]   ;;  %s2205_s4 = inlined_call_operand.hbm [shape: f32[5,128,128], index: 4, kind: input, shape index: {}]   ;;  %s2206_s5 = inlined_call_operand.hbm [shape: f32[5,128], index: 5, kind: input, shape index: {}]   ;;  %s2207_s6 = inlined_call_operand.hbm [shape: f32[5,16,128], index: 6, kind: output, shape index: {}]  }
   0x1   :  { %2210 = sst [smem:[#allocation20_spill]] %s2203_s2 }
   0x2   :  { %2211 = sst [smem:[#allocation21_spill]] %s2204_s3 }
   0x3   :  { %2212 = sst [smem:[#allocation22_spill]] %s2205_s4 }
   0x4   :  { %2213 = sst [smem:[#allocation23_spill]] %s2206_s5 }
   0x5   :  { %11 = vsyncpa [#allocation3], 0 }
   0x6   :  { %13 = vsyncpa [#allocation3 + $0x1], 0 }
   0x7   :  { %14 = vsyncpa [#allocation6], 0 }
   0x8   :  { %16 = vsyncpa [#allocation6 + $0x1], 0 }
   0x9   :  { %17 = vsyncpa [#allocation9], 0 }
   0xa   :  { %18 = vsyncpa [#allocation12], 0 }
   0xb   :  { %19 = vsyncpa [#allocation4], 0 }
   0xc   :  { %21 = vsyncpa [#allocation4 + $0x1], 0  ;;  %s1905_s21 = smov 0   ;;  %s1907_s22 = smov 0  }
   0xd   :  { %s1909_s23 = smov 0   ;;  %s1911_s24 = smov 0  }
   0xe LB: > { %s2214_s2 = sld [smem:[#allocation20_spill]]  ;;  %s1929_s28 = sadd.s32 4294967295, %s1856_s24   ;;  %s1856_s24 = sphi %s1911_s24, %s2231_s24   ;;  %s1852_s23 = sphi %s1909_s23, %s2230_s23   ;;  %s1848_s22 = sphi %s1907_s22, %s2229_s22   ;;  %s1844_s21 = sphi %s1905_s21, %s2228_s21  }
   0xf   : > { %p1435_p0 = scmp.ge.s32.totalorder %s1856_s24, 1  ;;  %p48_p1 = scmp.eq.s32.totalorder %s1929_s28, 0 }
  0x10   : > { %p194_p2 = scmp.lt.s32.totalorder %s1856_s24, 3  ;;  %s1858_s30 = smov [#allocation7]  }
  0x11   : > { %s207_s7 = sshll.u32 %s1858_s30, 4  ;;  %s2216_s3 = sld [smem:[#allocation21_spill]]  ;;  %s208_s7 = int_to_ptr.vmem [resolvable:$true] %s207_s7 }
  0x12   : > { %p1934_p3 = pnand %p1435_p0, %p194_p2  ;;  %s2218_s4 = sld [smem:[#allocation22_spill]] }
  0x13   : > { %s1859_s15 = smov [#allocation8]   ;;  %s1860_s17 = smov 512  }
  0x14   : > { %s205_s27 = sshll.u32 %s2214_s2, 4  ;;  %p1487_p4 = pneg %p1934_p3  ;;  %s206_s27 = int_to_ptr.hbm [resolvable:$true] %s205_s27 }
  0x15   : > { %s222_s16 = sshll.u32 %s1859_s15, 4  ;;  %s1861_s18 = smov 32   ;;  %s223_s16 = int_to_ptr.vmem [resolvable:$true] %s222_s16 }
  0x16   : > { %p1946_p6 = pnand %p1487_p4, %p48_p1  ;;  %s1862_s19 = smov [#allocation10]  }
  0x17   : > { %s220_s10 = sshll.u32 %s2216_s3, 4  ;;  %s233_s20 = sshll.u32 %s1862_s19, 4  ;;  %s221_s10 = int_to_ptr.hbm [resolvable:$true] %s220_s10  ;;  %s234_s20 = int_to_ptr.vmem [resolvable:$true] %s233_s20 }
  0x18   : > { %s231_s14 = sshll.u32 %s2218_s4, 4  ;;  %s2219_s5 = sld [smem:[#allocation23_spill]]  ;;  %s232_s14 = int_to_ptr.hbm [resolvable:$true] %s231_s14 }
  0x19   : > { %1490 = dma.hbm_to_vmem [thread:$0]  (!%p1946_p6), %s206_s27, 32768, %s208_s7, [#allocation6], %s1860_s17, %s1860_s17, %s1861_s18  }
  0x1a   : > { %1493 = dma.hbm_to_vmem [thread:$0]  (!%p1946_p6), %s221_s10, 128, %s223_s16, [#allocation9]  }
  0x1b   : > { %s2208_s27 = smov 128   ;;  %s2209_s7 = smov 8  }
  0x1c   : > { %1496 = dma.hbm_to_vmem [thread:$0]  (!%p1946_p6), %s232_s14, 10240, %s234_s20, [#allocation9], %s2208_s27, %s2208_s27, %s2209_s7  }
  0x1d   : > { %s1865_s8 = smov [#allocation11]   ;;  %s1434_s10 = sadd.s32 4294967294, %s1856_s24  }
  0x1e   : > { %s246_s30 = sshll.u32 %s2219_s5, 4  ;;  %s248_s9 = sshll.u32 %s1865_s8, 4  ;;  %s247_s30 = int_to_ptr.hbm [resolvable:$true] %s246_s30  ;;  %s249_s9 = int_to_ptr.vmem [resolvable:$true] %s248_s9 }
  0x1f   : > { %1499 = dma.hbm_to_vmem [thread:$0]  (!%p1946_p6), %s247_s30, 128, %s249_s9, [#allocation12]  }
  0x20   : > { %s1969_s12 = sadd.s32 1, %s1856_s24   ;;  %s34_s15 = sadd.s32 1, %s1852_s23 }
  0x21   : > { %s31_s13 = ssub.s32 %s1856_s24, %s1969_s12  ;;  %p41_p8 = scmp.ne.s32.totalorder %s1852_s23, %s1848_s22 }
  0x22   : > { %p32_p7 = scmp.eq.s32.totalorder %s31_s13, 0  ;;  %p42_p9 = scmp.eq.s32.totalorder %s1856_s24, 0 }
  0x23   : > { %p47_p10 = scmp.ne.s32.totalorder %s1848_s22, %s1844_s21  ;;  %p181_p13 = scmp.eq.s32.totalorder %s1929_s28, 1 }
  0x24   : > { %s1980_s14 = scalar_select %p32_p7, %s1852_s23, %s34_s15  }
  0x25   : > { %p1982_p11 = por %p42_p9, %p41_p8  ;;  %p1988_p12 = por %p48_p1, %p47_p10 }
  0x26   : > { %p187_p0 = scmp.eq.s32.totalorder %s1434_s10, 1  ;;  %p1515_p2 = scmp.lt.s32.totalorder %s1856_s24, 2 }
  0x27   : > { %s1995_s17 = sand.u32 1, %s1852_s23   ;;  %p1997_p4 = por %p181_p13, %p41_p8 }
  0x28   : > { %p2001_p6 = por %p187_p0, %p47_p10  ;;  %s1441_s20 = sshll.u32 %s1995_s17, 3 }
  0x29   : > { %s1442_s25 = sshll.u32 %s1856_s24, 3  ;;  %s263_s9 = scalar_lea.vmem [#allocation2], %s1441_s20 }
  0x2a   : > { %s267_s8 = scalar_lea.hbm %s2201_s0, %s1442_s25  ;;  %s271_s10 = sshll.u32 %s263_s9, 4  ;;  %s272_s10 = int_to_ptr.vmem [resolvable:$true] %s271_s10 }
  0x2b   : > { %s269_s13 = sshll.u32 %s267_s8, 4  ;;  %p2012_p7 = pnand %p1515_p2, %p1982_p11  ;;  %s270_s13 = int_to_ptr.hbm [resolvable:$true] %s269_s13 }
  0x2c   : > { %s1443_s27 = sshll.u32 %s1995_s17, 4  ;;  %s286_s3 = scalar_lea.hbm %s2202_s1, %s1442_s25 }
  0x2d   : > { %s260_s4 = scalar_lea.sflag [#allocation3], %s1995_s17  ;;  %s1714_s26 = sshra.s32 %s270_s13, 4  ;;  %s1715_s26 = int_to_ptr.hbm [resolvable:$true] %s1714_s26 }
  0x2e   : > { %s1716_s20 = scalar_lea.hbm %s1715_s26, 8  ;;  %p1718_p9 = pneg %p2012_p7 }
  0x2f   : > { %p1717_p8 = scmp.ne.s32.totalorder %s1715_s26, %s1716_s20  ;;  %s1721_s8 = scalar_lea.hbm %s2201_s0, 16 }
  0x30   : > { %p1722_p13 = scmp.lt.s32.totalorder %s1715_s26, %s2201_s0  ;;  %p1723_p0 = scmp.lt.s32.totalorder %s1721_s8, %s1716_s20 }
  0x31   : > { %p1719_p10 = pnand %p1718_p9, %p1717_p8 }
  0x32   : > { %p1724_p2 = por %p1723_p0, %p1722_p13 }
  0x33   : > { %p1720_p11 = pneg %p1719_p10 }
  0x35   : > { %p1725_p5 = pnand %p1724_p2, %p1720_p11 }
  0x37   : > { %1728 = shalt.err (!%p1725_p5)
}
  0x38   : > { %1503 = dma.hbm_to_vmem [thread:$0]  (!%p2012_p7), %s270_s13, 128, %s272_s10, %s260_s4  }
  0x39   : > { %s287_s2 = sshll.u32 %s286_s3, 4  ;;  %s282_s7 = scalar_lea.vmem [#allocation5], %s1443_s27  ;;  %s288_s2 = int_to_ptr.hbm [resolvable:$true] %s287_s2 }
  0x3a   : > { %s289_s17 = sshll.u32 %s282_s7, 4  ;;  %s278_s25 = sand.u32 1, %s1856_s24   ;;  %s290_s17 = int_to_ptr.vmem [resolvable:$true] %s289_s17 }
  0x3b   : > { %s279_s16 = scalar_lea.sflag [#allocation6], %s278_s25  ;;  %s1744_s30 = sshra.s32 %s288_s2, 4  ;;  %s1745_s30 = int_to_ptr.hbm [resolvable:$true] %s1744_s30 }
  0x3c   : > { %s1746_s5 = scalar_lea.hbm %s1745_s30, 16  ;;  %s1751_s8 = scalar_lea.hbm %s2202_s1, 32 }
  0x3d   : > { %p1747_p8 = scmp.ne.s32.totalorder %s1745_s30, %s1746_s5  ;;  %p1752_p11 = scmp.lt.s32.totalorder %s1745_s30, %s2202_s1 }
  0x3e   : > { %p1753_p13 = scmp.lt.s32.totalorder %s1751_s8, %s1746_s5 }
  0x3f   : > { %p1749_p10 = pnand %p1747_p8, %p1718_p9 }
  0x40   : > { %p1754_p0 = por %p1753_p13, %p1752_p11 }
  0x41   : > { %p1750_p5 = pneg %p1749_p10 }
  0x43   : > { %p1755_p2 = pnand %p1754_p0, %p1750_p5 }
  0x45   : > { %1758 = shalt.err (!%p1755_p2)
}
  0x46   : > { %s1866_s27 = smov 256   ;;  %s2225_s10 = smov 8  }
  0x47   : > { %s2226_s13 = smov 128   ;;  %301 = sbr.rel (%p1934_p3) target bundleno = 1131 (0x46b), region = 44 }
  0x48   : > { %1506 = dma.hbm_to_vmem [thread:$0]  (!%p2012_p7), %s288_s2, 256, %s290_s17, %s279_s16, %s1866_s27, %s2226_s13, %s2225_s10  }
  0x49   : > { %s2051_s9 = sand.u32 (!%p1934_p3), 1, %s1848_s22  }
  0x4a   : > { %s1446_s7 = sshll.u32 (!%p1934_p3), %s2051_s9, 3  ;;  %s304_s25 = scalar_lea.sflag (!%p1934_p3), [#allocation3], %s2051_s9 }
  0x4b   : > { %s2055_s30 = scalar_lea.vmem (!%p1934_p3), [#allocation2], %s1446_s7 }
  0x4c   : > { %1819 = dma.done.wait (%p1988_p12), %s304_s25, 128  }
  0x4d   : > { %1821 = vsyncadd (%p1988_p12), %s304_s25, 4294967168  ;;  %s313_s29 = sand.u32 1, %s1929_s28   ;;  %s1447_s15 = sshll.u32 %s2051_s9, 4 }
  0x4e   : > { %s314_s2 = scalar_lea.sflag [#allocation6], %s313_s29  ;;  %s2063_s17 = scalar_lea.vmem [#allocation5], %s1447_s15 }
  0x4f   : > { %1823 = dma.done.wait (%p1988_p12), %s314_s2, 256  }
  0x50   : > { %1825 = vsyncadd (%p1988_p12), %s314_s2, 4294967040 }
  0x51   : > { %1827 = dma.done.wait (%p48_p1), [#allocation6], 32768  }
  0x52   : > { %1829 = vsyncadd (%p48_p1), [#allocation6], 4294934528 }
  0x53   : > { %1831 = dma.done.wait (%p48_p1), [#allocation9], 10368  }
  0x54   : > { %1833 = vsyncadd (%p48_p1), [#allocation9], 4294956928 }
  0x55   : > { %1835 = dma.done.wait (%p48_p1), [#allocation12], 128  }
  0x56   : > { %1837 = vsyncadd (%p48_p1), [#allocation12], 4294967168  ;;  %v434_v0 = vld [vmem:[#allocation7 + $0x1e0] sm:$0xff]  ;;  %v435_v1 = vld [vmem:[#allocation7 + $0x1e8] sm:$0xff]  ;;  %s1464_s11 = smul.u32 40, %s2051_s9  ;;  %s1461_s5 = sshll.u32 %s1929_s28, 3 }
  0x57   : > { %v430_v2 = vld [vmem:[#allocation7 + $0x1c0] sm:$0xff]  ;;  %512 = vmatpush.msra.mxu0 %v434_v0  ;;  %552 = vmatpush.msra.mxu2 %v435_v1  ;;  %v431_v4 = vld [vmem:[#allocation7 + $0x1c8] sm:$0xff]  ;;  %v2082_v62 = vld [vmem:[%s2055_s30] sm:$0xff]  ;;  %s1296_s8 = scalar_lea.hbm %s2207_s6, %s1461_s5  ;;  %s1286_s27 = scalar_lea.sflag [#allocation4], %s2051_s9 }
  0x58   : > { %v498_v3 = vld [vmem:[#allocation7 + $0x3e0] sm:$0xff]  ;;  %v499_v5 = vld [vmem:[#allocation7 + $0x3e8] sm:$0xff]  ;;  %v437_v63 = vld [vmem:[#allocation7 + $0x1f8] sm:$0xff]  ;;  %s2138_s16 = scalar_lea.vmem [#allocation13], %s1464_s11  ;;  %s1299_s3 = sshll.u32 %s1296_s8, 4  ;;  %s1300_s3 = int_to_ptr.hbm [resolvable:$true] %s1299_s3 }
  0x59   : > { %532 = vmatpush.msra.mxu1 %v498_v3  ;;  %572 = vmatpush.msra.mxu3 %v499_v5  ;;  %v426_v6 = vld [vmem:[#allocation7 + $0x1a0] sm:$0xff]  ;;  %v427_v8 = vld [vmem:[#allocation7 + $0x1a8] sm:$0xff]  ;;  %v433_v3 = vld [vmem:[#allocation7 + $0x1d8] sm:$0xff]  ;;  %s1297_s4 = sshll.u32 %s2138_s16, 4  ;;  %s1788_s10 = sshra.s32 %s1300_s3, 4  ;;  %s1298_s4 = int_to_ptr.vmem [resolvable:$true] %s1297_s4  ;;  %s1789_s10 = int_to_ptr.hbm [resolvable:$true] %s1788_s10 }
  0x5a   : > { %v494_v7 = vld [vmem:[#allocation7 + $0x3c0] sm:$0xff]  ;;  %513 = vmatpush.msra.mxu0 %v430_v2  ;;  %553 = vmatpush.msra.mxu2 %v431_v4  ;;  %v495_v9 = vld [vmem:[#allocation7 + $0x3c8] sm:$0xff]  ;;  %v501_v4 = vld [vmem:[#allocation7 + $0x3f8] sm:$0xff]  ;;  %s1790_s13 = scalar_lea.hbm %s1789_s10, 40  ;;  %s1794_s25 = scalar_lea.hbm %s2207_s6, 80 }
  0x5b   : > { %v490_v10 = vld [vmem:[#allocation7 + $0x3a0] sm:$0xff]  ;;  %533 = vmatpush.msra.mxu1 %v494_v7  ;;  %573 = vmatpush.msra.mxu3 %v495_v9  ;;  %v423_v12 = vld [vmem:[#allocation7 + $0x188] sm:$0xff]  ;;  %v436_v5 = vld [vmem:[#allocation7 + $0x1f0] sm:$0xff]  ;;  %p1791_p1 = scmp.ne.s32.totalorder %s1789_s10, %s1790_s13  ;;  %p1795_p7 = scmp.lt.s32.totalorder %s1789_s10, %s2207_s6 }
  0x5c   : > { %v422_v11 = vld [vmem:[#allocation7 + $0x180] sm:$0xff]  ;;  %v491_v13 = vld [vmem:[#allocation7 + $0x3a8] sm:$0xff]  ;;  %514 = vmatpush.msra.mxu0 %v426_v6  ;;  %554 = vmatpush.msra.mxu2 %v427_v8  ;;  %v429_v6 = vld [vmem:[#allocation7 + $0x1b8] sm:$0xff]  ;;  %p1796_p9 = scmp.lt.s32.totalorder %s1794_s25, %s1790_s13 }
  0x5d   : > { %v486_v14 = vld [vmem:[#allocation7 + $0x380] sm:$0xff]  ;;  %v487_v15 = vld [vmem:[#allocation7 + $0x388] sm:$0xff]  ;;  %534 = vmatpush.msra.mxu1 %v490_v10  ;;  %574 = vmatpush.msra.mxu3 %v491_v13  ;;  %v500_v7 = vld [vmem:[#allocation7 + $0x3f0] sm:$0xff]  ;;  %p1792_p3 = pnand %p1791_p1, %p1997_p4 }
  0x5e   : > { %v418_v16 = vld [vmem:[#allocation7 + $0x160] sm:$0xff]  ;;  %v419_v17 = vld [vmem:[#allocation7 + $0x168] sm:$0xff]  ;;  %515 = vmatpush.msra.mxu0 %v422_v11  ;;  %555 = vmatpush.msra.mxu2 %v423_v12  ;;  %v497_v8 = vld [vmem:[#allocation7 + $0x3d8] sm:$0xff]  ;;  %p1797_p8 = por %p1796_p9, %p1795_p7 }
  0x5f   : > { %v482_v18 = vld [vmem:[#allocation7 + $0x360] sm:$0xff]  ;;  %v483_v19 = vld [vmem:[#allocation7 + $0x368] sm:$0xff]  ;;  %535 = vmatpush.msra.mxu1 %v486_v14  ;;  %575 = vmatpush.msra.mxu3 %v487_v15  ;;  %v432_v9 = vld [vmem:[#allocation7 + $0x1d0] sm:$0xff]  ;;  %p1793_p12 = pneg %p1792_p3 }
  0x60   : > { %v414_v20 = vld [vmem:[#allocation7 + $0x140] sm:$0xff]  ;;  %v415_v21 = vld [vmem:[#allocation7 + $0x148] sm:$0xff]  ;;  %516 = vmatpush.msra.mxu0 %v418_v16  ;;  %556 = vmatpush.msra.mxu2 %v419_v17  ;;  %v425_v10 = vld [vmem:[#allocation7 + $0x198] sm:$0xff] }
  0x61   : > { %v478_v22 = vld [vmem:[#allocation7 + $0x340] sm:$0xff]  ;;  %v479_v23 = vld [vmem:[#allocation7 + $0x348] sm:$0xff]  ;;  %536 = vmatpush.msra.mxu1 %v482_v18  ;;  %576 = vmatpush.msra.mxu3 %v483_v19  ;;  %v496_v11 = vld [vmem:[#allocation7 + $0x3d0] sm:$0xff]  ;;  %p1798_p10 = pnand %p1797_p8, %p1793_p12 }
  0x62   : > { %v410_v24 = vld [vmem:[#allocation7 + $0x120] sm:$0xff]  ;;  %v411_v25 = vld [vmem:[#allocation7 + $0x128] sm:$0xff]  ;;  %517 = vmatpush.msra.mxu0 %v414_v20  ;;  %557 = vmatpush.msra.mxu2 %v415_v21  ;;  %v493_v12 = vld [vmem:[#allocation7 + $0x3b8] sm:$0xff] }
  0x63   : > { %v474_v26 = vld [vmem:[#allocation7 + $0x320] sm:$0xff]  ;;  %v475_v27 = vld [vmem:[#allocation7 + $0x328] sm:$0xff]  ;;  %537 = vmatpush.msra.mxu1 %v478_v22  ;;  %577 = vmatpush.msra.mxu3 %v479_v23  ;;  %v428_v13 = vld [vmem:[#allocation7 + $0x1b0] sm:$0xff] }
  0x64   : > { %v406_v28 = vld [vmem:[#allocation7 + $0x100] sm:$0xff]  ;;  %v407_v29 = vld [vmem:[#allocation7 + $0x108] sm:$0xff]  ;;  %518 = vmatpush.msra.mxu0 %v410_v24  ;;  %558 = vmatpush.msra.mxu2 %v411_v25  ;;  %v421_v14 = vld [vmem:[#allocation7 + $0x178] sm:$0xff] }
  0x65   : > { %v470_v30 = vld [vmem:[#allocation7 + $0x300] sm:$0xff]  ;;  %v471_v31 = vld [vmem:[#allocation7 + $0x308] sm:$0xff]  ;;  %538 = vmatpush.msra.mxu1 %v474_v26  ;;  %578 = vmatpush.msra.mxu3 %v475_v27  ;;  %v492_v15 = vld [vmem:[#allocation7 + $0x3b0] sm:$0xff] }
  0x66   : > { %v402_v32 = vld [vmem:[#allocation7 + $0xe0] sm:$0xff]  ;;  %v403_v33 = vld [vmem:[#allocation7 + $0xe8] sm:$0xff]  ;;  %519 = vmatpush.msra.mxu0 %v406_v28  ;;  %559 = vmatpush.msra.mxu2 %v407_v29  ;;  %v489_v16 = vld [vmem:[#allocation7 + $0x398] sm:$0xff] }
  0x67   : > { %v466_v34 = vld [vmem:[#allocation7 + $0x2e0] sm:$0xff]  ;;  %v467_v35 = vld [vmem:[#allocation7 + $0x2e8] sm:$0xff]  ;;  %539 = vmatpush.msra.mxu1 %v470_v30  ;;  %579 = vmatpush.msra.mxu3 %v471_v31  ;;  %v424_v17 = vld [vmem:[#allocation7 + $0x190] sm:$0xff] }
  0x68   : > { %v398_v36 = vld [vmem:[#allocation7 + $0xc0] sm:$0xff]  ;;  %v399_v37 = vld [vmem:[#allocation7 + $0xc8] sm:$0xff]  ;;  %520 = vmatpush.msra.mxu0 %v402_v32  ;;  %560 = vmatpush.msra.mxu2 %v403_v33  ;;  %v417_v18 = vld [vmem:[#allocation7 + $0x158] sm:$0xff] }
  0x69   : > { %v462_v38 = vld [vmem:[#allocation7 + $0x2c0] sm:$0xff]  ;;  %v463_v39 = vld [vmem:[#allocation7 + $0x2c8] sm:$0xff]  ;;  %540 = vmatpush.msra.mxu1 %v466_v34  ;;  %580 = vmatpush.msra.mxu3 %v467_v35  ;;  %v488_v19 = vld [vmem:[#allocation7 + $0x390] sm:$0xff] }
  0x6a   : > { %v394_v40 = vld [vmem:[#allocation7 + $0xa0] sm:$0xff]  ;;  %v395_v41 = vld [vmem:[#allocation7 + $0xa8] sm:$0xff]  ;;  %521 = vmatpush.msra.mxu0 %v398_v36  ;;  %561 = vmatpush.msra.mxu2 %v399_v37  ;;  %v485_v20 = vld [vmem:[#allocation7 + $0x378] sm:$0xff] }
  0x6b   : > { %v458_v42 = vld [vmem:[#allocation7 + $0x2a0] sm:$0xff]  ;;  %v459_v43 = vld [vmem:[#allocation7 + $0x2a8] sm:$0xff]  ;;  %541 = vmatpush.msra.mxu1 %v462_v38  ;;  %581 = vmatpush.msra.mxu3 %v463_v39  ;;  %v413_v21 = vld [vmem:[#allocation7 + $0x138] sm:$0xff] }
  0x6c   : > { %v390_v44 = vld [vmem:[#allocation7 + $0x80] sm:$0xff]  ;;  %v391_v45 = vld [vmem:[#allocation7 + $0x88] sm:$0xff]  ;;  %522 = vmatpush.msra.mxu0 %v394_v40  ;;  %562 = vmatpush.msra.mxu2 %v395_v41  ;;  %v420_v22 = vld [vmem:[#allocation7 + $0x170] sm:$0xff] }
  0x6d   : > { %v454_v46 = vld [vmem:[#allocation7 + $0x280] sm:$0xff]  ;;  %v455_v47 = vld [vmem:[#allocation7 + $0x288] sm:$0xff]  ;;  %542 = vmatpush.msra.mxu1 %v458_v42  ;;  %582 = vmatpush.msra.mxu3 %v459_v43  ;;  %v481_v23 = vld [vmem:[#allocation7 + $0x358] sm:$0xff] }
  0x6e   : > { %v386_v48 = vld [vmem:[#allocation7 + $0x60] sm:$0xff]  ;;  %v387_v49 = vld [vmem:[#allocation7 + $0x68] sm:$0xff]  ;;  %523 = vmatpush.msra.mxu0 %v390_v44  ;;  %563 = vmatpush.msra.mxu2 %v391_v45  ;;  %v409_v24 = vld [vmem:[#allocation7 + $0x118] sm:$0xff] }
  0x6f   : > { %v450_v50 = vld [vmem:[#allocation7 + $0x260] sm:$0xff]  ;;  %v451_v51 = vld [vmem:[#allocation7 + $0x268] sm:$0xff]  ;;  %543 = vmatpush.msra.mxu1 %v454_v46  ;;  %583 = vmatpush.msra.mxu3 %v455_v47  ;;  %v484_v25 = vld [vmem:[#allocation7 + $0x370] sm:$0xff] }
  0x70   : > { %v382_v52 = vld [vmem:[#allocation7 + $0x40] sm:$0xff]  ;;  %v383_v53 = vld [vmem:[#allocation7 + $0x48] sm:$0xff]  ;;  %524 = vmatpush.msra.mxu0 %v386_v48  ;;  %564 = vmatpush.msra.mxu2 %v387_v49  ;;  %v477_v26 = vld [vmem:[#allocation7 + $0x338] sm:$0xff] }
  0x71   : > { %v446_v54 = vld [vmem:[#allocation7 + $0x240] sm:$0xff]  ;;  %v447_v55 = vld [vmem:[#allocation7 + $0x248] sm:$0xff]  ;;  %544 = vmatpush.msra.mxu1 %v450_v50  ;;  %584 = vmatpush.msra.mxu3 %v451_v51  ;;  %v416_v27 = vld [vmem:[#allocation7 + $0x150] sm:$0xff] }
  0x72   : > { %v378_v56 = vld [vmem:[#allocation7 + $0x20] sm:$0xff]  ;;  %v379_v57 = vld [vmem:[#allocation7 + $0x28] sm:$0xff]  ;;  %525 = vmatpush.msra.mxu0 %v382_v52  ;;  %565 = vmatpush.msra.mxu2 %v383_v53  ;;  %v480_v28 = vld [vmem:[#allocation7 + $0x350] sm:$0xff] }
  0x73   : > { %v442_v58 = vld [vmem:[#allocation7 + $0x220] sm:$0xff]  ;;  %v443_v59 = vld [vmem:[#allocation7 + $0x228] sm:$0xff]  ;;  %545 = vmatpush.msra.mxu1 %v446_v54  ;;  %585 = vmatpush.msra.mxu3 %v447_v55  ;;  %v412_v29 = vld [vmem:[#allocation7 + $0x130] sm:$0xff] }
  0x74   : > { %v374_v60 = vld [vmem:[#allocation7] sm:$0xff]  ;;  %v375_v61 = vld [vmem:[#allocation7 + $0x8] sm:$0xff]  ;;  %526 = vmatpush.msra.mxu0 %v378_v56  ;;  %566 = vmatpush.msra.mxu2 %v379_v57  ;;  %v405_v30 = vld [vmem:[#allocation7 + $0xf8] sm:$0xff] }
  0x75   : > { %546 = vmatpush.msra.mxu1 %v442_v58  ;;  %586 = vmatpush.msra.mxu3 %v443_v59  ;;  %v438_v0 = vld [vmem:[#allocation7 + $0x200] sm:$0xff]  ;;  %v439_v1 = vld [vmem:[#allocation7 + $0x208] sm:$0xff]  ;;  %v476_v31 = vld [vmem:[#allocation7 + $0x330] sm:$0xff] }
  0x76   : > { %527 = vmatpush.msra.mxu0 %v374_v60  ;;  %567 = vmatpush.msra.mxu2 %v375_v61  ;;  %v2085_v2 = vld [vmem:[%s2063_s17] sm:$0xff]  ;;  %v473_v32 = vld [vmem:[#allocation7 + $0x318] sm:$0xff] }
  0x77   : > { %528 = vmatmul.f32.vlgmr.msra.gmra.mxu0 %v2082_v62  ;;  %568 = vmatmul.f32.vlgmr.msra.gmra.mxu2 %v2082_v62  ;;  %v408_v33 = vld [vmem:[#allocation7 + $0x110] sm:$0xff]  ;;  %v401_v34 = vld [vmem:[#allocation7 + $0xd8] sm:$0xff] }
  0x78   : > { %632 = vmatpush.msrb.mxu2 %v437_v63  ;;  %547 = vmatpush.msra.mxu1 %v438_v0  ;;  %v472_v35 = vld [vmem:[#allocation7 + $0x310] sm:$0xff]  ;;  %v469_v36 = vld [vmem:[#allocation7 + $0x2f8] sm:$0xff] }
  0x79   : > { %587 = vmatpush.msra.mxu3 %v439_v1  ;;  %548 = vmatmul.f32.vlgmr.msra.gmra.mxu1 %v2085_v2  ;;  %v404_v37 = vld [vmem:[#allocation7 + $0xf0] sm:$0xff]  ;;  %v397_v38 = vld [vmem:[#allocation7 + $0xb8] sm:$0xff] }
  0x7a   : > { %588 = vmatmul.f32.vlgmr.msra.gmra.mxu3 %v2085_v2  ;;  %633 = vmatpush.msrb.mxu2 %v433_v3  ;;  %v468_v39 = vld [vmem:[#allocation7 + $0x2f0] sm:$0xff]  ;;  %v465_v40 = vld [vmem:[#allocation7 + $0x2d8] sm:$0xff] }
  0x7b   : > { %652 = vmatpush.msrb.mxu3 %v501_v4  ;;  %592 = vmatpush.msrb.mxu0 %v436_v5  ;;  %v400_v41 = vld [vmem:[#allocation7 + $0xd0] sm:$0xff]  ;;  %v393_v42 = vld [vmem:[#allocation7 + $0x98] sm:$0xff]  ;;  %v780_v4 = vld [vmem:[#allocation7 + $0x5e0] sm:$0xff] }
  0x7c   : > { %634 = vmatpush.msrb.mxu2 %v429_v6  ;;  %612 = vmatpush.msrb.mxu1 %v500_v7  ;;  %v464_v43 = vld [vmem:[#allocation7 + $0x2d0] sm:$0xff]  ;;  %v461_v44 = vld [vmem:[#allocation7 + $0x2b8] sm:$0xff]  ;;  %v781_v5 = vld [vmem:[#allocation7 + $0x5e8] sm:$0xff] }
  0x7d   : > { %653 = vmatpush.msrb.mxu3 %v497_v8  ;;  %593 = vmatpush.msrb.mxu0 %v432_v9  ;;  %v396_v45 = vld [vmem:[#allocation7 + $0xb0] sm:$0xff]  ;;  %v389_v46 = vld [vmem:[#allocation7 + $0x78] sm:$0xff]  ;;  %v776_v6 = vld [vmem:[#allocation7 + $0x5c0] sm:$0xff] }
  0x7e   : > { %635 = vmatpush.msrb.mxu2 %v425_v10  ;;  %613 = vmatpush.msrb.mxu1 %v496_v11  ;;  %v460_v47 = vld [vmem:[#allocation7 + $0x2b0] sm:$0xff]  ;;  %v457_v48 = vld [vmem:[#allocation7 + $0x298] sm:$0xff]  ;;  %v844_v7 = vld [vmem:[#allocation7 + $0x7e0] sm:$0xff] }
  0x7f   : > { %654 = vmatpush.msrb.mxu3 %v493_v12  ;;  %594 = vmatpush.msrb.mxu0 %v428_v13  ;;  %v392_v49 = vld [vmem:[#allocation7 + $0x90] sm:$0xff]  ;;  %v385_v50 = vld [vmem:[#allocation7 + $0x58] sm:$0xff]  ;;  %v777_v8 = vld [vmem:[#allocation7 + $0x5c8] sm:$0xff] }
  0x80   : > { %636 = vmatpush.msrb.mxu2 %v421_v14  ;;  %614 = vmatpush.msrb.mxu1 %v492_v15  ;;  %v456_v51 = vld [vmem:[#allocation7 + $0x290] sm:$0xff]  ;;  %v453_v52 = vld [vmem:[#allocation7 + $0x278] sm:$0xff]  ;;  %v845_v9 = vld [vmem:[#allocation7 + $0x7e8] sm:$0xff] }
  0x81   : > { %655 = vmatpush.msrb.mxu3 %v489_v16  ;;  %595 = vmatpush.msrb.mxu0 %v424_v17  ;;  %v388_v53 = vld [vmem:[#allocation7 + $0x70] sm:$0xff]  ;;  %v381_v54 = vld [vmem:[#allocation7 + $0x38] sm:$0xff]  ;;  %v772_v10 = vld [vmem:[#allocation7 + $0x5a0] sm:$0xff] }
  0x82   : > { %637 = vmatpush.msrb.mxu2 %v417_v18  ;;  %615 = vmatpush.msrb.mxu1 %v488_v19  ;;  %v452_v55 = vld [vmem:[#allocation7 + $0x270] sm:$0xff]  ;;  %v449_v56 = vld [vmem:[#allocation7 + $0x258] sm:$0xff]  ;;  %v840_v11 = vld [vmem:[#allocation7 + $0x7c0] sm:$0xff] }
  0x83   : > { %656 = vmatpush.msrb.mxu3 %v485_v20  ;;  %596 = vmatpush.msrb.mxu0 %v420_v22  ;;  %v384_v57 = vld [vmem:[#allocation7 + $0x50] sm:$0xff]  ;;  %v377_v58 = vld [vmem:[#allocation7 + $0x18] sm:$0xff]  ;;  %v773_v12 = vld [vmem:[#allocation7 + $0x5a8] sm:$0xff] }
  0x84   : > { %638 = vmatpush.msrb.mxu2 %v413_v21  ;;  %616 = vmatpush.msrb.mxu1 %v484_v25  ;;  %v448_v59 = vld [vmem:[#allocation7 + $0x250] sm:$0xff]  ;;  %v445_v60 = vld [vmem:[#allocation7 + $0x238] sm:$0xff]  ;;  %v768_v13 = vld [vmem:[#allocation7 + $0x580] sm:$0xff] }
  0x85   : > { %657 = vmatpush.msrb.mxu3 %v481_v23  ;;  %597 = vmatpush.msrb.mxu0 %v416_v27  ;;  %v380_v61 = vld [vmem:[#allocation7 + $0x30] sm:$0xff]  ;;  %v441_v0 = vld [vmem:[#allocation7 + $0x218] sm:$0xff]  ;;  %v836_v14 = vld [vmem:[#allocation7 + $0x7a0] sm:$0xff] }
  0x86   : > { %639 = vmatpush.msrb.mxu2 %v409_v24  ;;  %617 = vmatpush.msrb.mxu1 %v480_v28  ;;  %v444_v63 = vld [vmem:[#allocation7 + $0x230] sm:$0xff]  ;;  %v769_v15 = vld [vmem:[#allocation7 + $0x588] sm:$0xff]  ;;  %v764_v17 = vld [vmem:[#allocation7 + $0x560] sm:$0xff] }
  0x87   : > { %658 = vmatpush.msrb.mxu3 %v477_v26  ;;  %598 = vmatpush.msrb.mxu0 %v412_v29  ;;  %v376_v1 = vld [vmem:[#allocation7 + $0x10] sm:$0xff]  ;;  %v837_v16 = vld [vmem:[#allocation7 + $0x7a8] sm:$0xff]  ;;  %v832_v18 = vld [vmem:[#allocation7 + $0x780] sm:$0xff] }
  0x88   : > { %640 = vmatpush.msrb.mxu2 %v405_v30  ;;  %618 = vmatpush.msrb.mxu1 %v476_v31  ;;  %v440_v3 = vld [vmem:[#allocation7 + $0x210] sm:$0xff]  ;;  %v765_v19 = vld [vmem:[#allocation7 + $0x568] sm:$0xff]  ;;  %v760_v21 = vld [vmem:[#allocation7 + $0x540] sm:$0xff] }
  0x89   : > { %659 = vmatpush.msrb.mxu3 %v473_v32  ;;  %599 = vmatpush.msrb.mxu0 %v408_v33  ;;  %v833_v20 = vld [vmem:[#allocation7 + $0x788] sm:$0xff]  ;;  %v828_v22 = vld [vmem:[#allocation7 + $0x760] sm:$0xff] }
  0x8a   : > { %641 = vmatpush.msrb.mxu2 %v401_v34  ;;  %619 = vmatpush.msrb.mxu1 %v472_v35  ;;  %v761_v23 = vld [vmem:[#allocation7 + $0x548] sm:$0xff]  ;;  %v756_v25 = vld [vmem:[#allocation7 + $0x520] sm:$0xff] }
  0x8b   : > { %660 = vmatpush.msrb.mxu3 %v469_v36  ;;  %600 = vmatpush.msrb.mxu0 %v404_v37  ;;  %v829_v24 = vld [vmem:[#allocation7 + $0x768] sm:$0xff]  ;;  %v824_v26 = vld [vmem:[#allocation7 + $0x740] sm:$0xff] }
  0x8c   : > { %642 = vmatpush.msrb.mxu2 %v397_v38  ;;  %620 = vmatpush.msrb.mxu1 %v468_v39  ;;  %v757_v27 = vld [vmem:[#allocation7 + $0x528] sm:$0xff]  ;;  %v752_v29 = vld [vmem:[#allocation7 + $0x500] sm:$0xff] }
  0x8d   : > { %661 = vmatpush.msrb.mxu3 %v465_v40  ;;  %601 = vmatpush.msrb.mxu0 %v400_v41  ;;  %v825_v28 = vld [vmem:[#allocation7 + $0x748] sm:$0xff]  ;;  %v820_v30 = vld [vmem:[#allocation7 + $0x720] sm:$0xff] }
  0x8e   : > { %643 = vmatpush.msrb.mxu2 %v393_v42  ;;  %621 = vmatpush.msrb.mxu1 %v464_v43  ;;  %v753_v31 = vld [vmem:[#allocation7 + $0x508] sm:$0xff]  ;;  %v748_v33 = vld [vmem:[#allocation7 + $0x4e0] sm:$0xff] }
  0x8f   : > { %662 = vmatpush.msrb.mxu3 %v461_v44  ;;  %602 = vmatpush.msrb.mxu0 %v396_v45  ;;  %v821_v32 = vld [vmem:[#allocation7 + $0x728] sm:$0xff]  ;;  %v816_v34 = vld [vmem:[#allocation7 + $0x700] sm:$0xff] }
  0x90   : > { %644 = vmatpush.msrb.mxu2 %v389_v46  ;;  %622 = vmatpush.msrb.mxu1 %v460_v47  ;;  %v749_v35 = vld [vmem:[#allocation7 + $0x4e8] sm:$0xff]  ;;  %v744_v37 = vld [vmem:[#allocation7 + $0x4c0] sm:$0xff] }
  0x91   : > { %663 = vmatpush.msrb.mxu3 %v457_v48  ;;  %603 = vmatpush.msrb.mxu0 %v392_v49  ;;  %v817_v36 = vld [vmem:[#allocation7 + $0x708] sm:$0xff]  ;;  %v812_v38 = vld [vmem:[#allocation7 + $0x6e0] sm:$0xff] }
  0x92   : > { %645 = vmatpush.msrb.mxu2 %v385_v50  ;;  %623 = vmatpush.msrb.mxu1 %v456_v51  ;;  %v745_v39 = vld [vmem:[#allocation7 + $0x4c8] sm:$0xff]  ;;  %v740_v41 = vld [vmem:[#allocation7 + $0x4a0] sm:$0xff] }
  0x93   : > { %664 = vmatpush.msrb.mxu3 %v453_v52  ;;  %604 = vmatpush.msrb.mxu0 %v388_v53  ;;  %v813_v40 = vld [vmem:[#allocation7 + $0x6e8] sm:$0xff]  ;;  %v808_v42 = vld [vmem:[#allocation7 + $0x6c0] sm:$0xff] }
  0x94   : > { %646 = vmatpush.msrb.mxu2 %v381_v54  ;;  %624 = vmatpush.msrb.mxu1 %v452_v55  ;;  %v741_v43 = vld [vmem:[#allocation7 + $0x4a8] sm:$0xff]  ;;  %v2095_v44 = vld [vmem:[#allocation8] ss:$2 sm:$0xf] }
  0x95   : > { %665 = vmatpush.msrb.mxu3 %v449_v56  ;;  %605 = vmatpush.msrb.mxu0 %v384_v57  ;;  %v809_v45 = vld [vmem:[#allocation7 + $0x6c8] sm:$0xff]  ;;  %v736_v46 = vld [vmem:[#allocation7 + $0x480] sm:$0xff]  ;;  %v504_v53 = vperm.slane %v2095_v44, 0 }
  0x96   : > { %647 = vmatpush.msrb.mxu2 %v377_v58  ;;  %625 = vmatpush.msrb.mxu1 %v448_v59  ;;  %v804_v47 = vld [vmem:[#allocation7 + $0x6a0] sm:$0xff]  ;;  %v737_v48 = vld [vmem:[#allocation7 + $0x488] sm:$0xff] }
  0x97   : > { %666 = vmatpush.msrb.mxu3 %v445_v60  ;;  %648 = vmatmul.f32.vlgmr.msrb.gmra.mxu2 %v2082_v62  ;;  %v805_v49 = vld [vmem:[#allocation7 + $0x6a8] sm:$0xff]  ;;  %v732_v50 = vld [vmem:[#allocation7 + $0x460] sm:$0xff] }
  0x98   : > { %606 = vmatpush.msrb.mxu0 %v380_v61  ;;  %626 = vmatpush.msrb.mxu1 %v444_v63  ;;  %v800_v51 = vld [vmem:[#allocation7 + $0x680] sm:$0xff]  ;;  %v733_v52 = vld [vmem:[#allocation7 + $0x468] sm:$0xff] }
  0x99   : > { %667 = vmatpush.msrb.mxu3 %v441_v0  ;;  %899 = vmatpush.msra.mxu2 %v781_v5  ;;  %v801_v54 = vld [vmem:[#allocation7 + $0x688] sm:$0xff]  ;;  %v728_v55 = vld [vmem:[#allocation7 + $0x440] sm:$0xff] }
  0x9a   : > { %668 = vmatmul.f32.vlgmr.msrb.gmra.mxu3 %v2085_v2  ;;  %607 = vmatpush.msrb.mxu0 %v376_v1  ;;  %v796_v56 = vld [vmem:[#allocation7 + $0x660] sm:$0xff]  ;;  %v729_v57 = vld [vmem:[#allocation7 + $0x448] sm:$0xff] }
  0x9b   : > { %608 = vmatmul.f32.vlgmr.msrb.gmra.mxu0 %v2082_v62  ;;  %627 = vmatpush.msrb.mxu1 %v440_v3  ;;  %v841_v62 = vld [vmem:[#allocation7 + $0x7c8] sm:$0xff]  ;;  %v724_v60 = vld [vmem:[#allocation7 + $0x420] sm:$0xff] }
  0x9c   : > { %628 = vmatmul.f32.vlgmr.msrb.gmra.mxu1 %v2085_v2  ;;  %859 = vmatpush.msra.mxu0 %v780_v4  ;;  %v797_v58 = vld [vmem:[#allocation7 + $0x668] sm:$0xff]  ;;  %v792_v61 = vld [vmem:[#allocation7 + $0x640] sm:$0xff] }
  0x9d   : > { %879 = vmatpush.msra.mxu1 %v844_v7  ;;  %900 = vmatpush.msra.mxu2 %v777_v8  ;;  %v725_v63 = vld [vmem:[#allocation7 + $0x428] sm:$0xff]  ;;  %v720_v4 = vld [vmem:[#allocation7 + $0x400] sm:$0xff]  ;;  %v505_v8 = vperm.slane %v2095_v44, 1 }
  0x9e   : > { %860 = vmatpush.msra.mxu0 %v776_v6  ;;  %919 = vmatpush.msra.mxu3 %v845_v9  ;;  %v793_v1 = vld [vmem:[#allocation7 + $0x648] sm:$0xff]  ;;  %v788_v5 = vld [vmem:[#allocation7 + $0x620] sm:$0xff] }
  0x9f   : > { %880 = vmatpush.msra.mxu1 %v840_v11  ;;  %901 = vmatpush.msra.mxu2 %v773_v12  ;;  %v721_v6 = vld [vmem:[#allocation7 + $0x408] sm:$0xff]  ;;  %v783_v11 = vld [vmem:[#allocation7 + $0x5f8] sm:$0xff]  ;;  %v784_v12 = vld [vmem:[#allocation7 + $0x600] sm:$0xff] }
  0xa0   : > { %861 = vmatpush.msra.mxu0 %v772_v10  ;;  %920 = vmatpush.msra.mxu3 %v841_v62  ;;  %v789_v9 = vld [vmem:[#allocation7 + $0x628] sm:$0xff]  ;;  %v782_v10 = vld [vmem:[#allocation7 + $0x5f0] sm:$0xff] }
  0xa1   : > { %881 = vmatpush.msra.mxu1 %v836_v14  ;;  %902 = vmatpush.msra.mxu2 %v769_v15  ;;  %v785_v62 = vld [vmem:[#allocation7 + $0x608] sm:$0xff]  ;;  %v846_v15 = vld [vmem:[#allocation7 + $0x7f0] sm:$0xff] }
  0xa2   : > { %862 = vmatpush.msra.mxu0 %v768_v13  ;;  %921 = vmatpush.msra.mxu3 %v837_v16  ;;  %v778_v13 = vld [vmem:[#allocation7 + $0x5d0] sm:$0xff]  ;;  %v779_v16 = vld [vmem:[#allocation7 + $0x5d8] sm:$0xff] }
  0xa3   : > { %882 = vmatpush.msra.mxu1 %v832_v18  ;;  %903 = vmatpush.msra.mxu2 %v765_v19 }
  0xa4   : > { %863 = vmatpush.msra.mxu0 %v764_v17  ;;  %922 = vmatpush.msra.mxu3 %v833_v20  ;;  %v847_v17 = vld [vmem:[#allocation7 + $0x7f8] sm:$0xff]  ;;  %v774_v20 = vld [vmem:[#allocation7 + $0x5b0] sm:$0xff] }
  0xa5   : > { %883 = vmatpush.msra.mxu1 %v828_v22  ;;  %904 = vmatpush.msra.mxu2 %v761_v23  ;;  %v775_v22 = vld [vmem:[#allocation7 + $0x5b8] sm:$0xff] }
  0xa6   : > { %864 = vmatpush.msra.mxu0 %v760_v21  ;;  %923 = vmatpush.msra.mxu3 %v829_v24  ;;  %v842_v21 = vld [vmem:[#allocation7 + $0x7d0] sm:$0xff]  ;;  %v843_v23 = vld [vmem:[#allocation7 + $0x7d8] sm:$0xff] }
  0xa7   : > { %884 = vmatpush.msra.mxu1 %v824_v26  ;;  %905 = vmatpush.msra.mxu2 %v757_v27  ;;  %v838_v26 = vld [vmem:[#allocation7 + $0x7b0] sm:$0xff]  ;;  %v771_v27 = vld [vmem:[#allocation7 + $0x598] sm:$0xff] }
  0xa8   : > { %865 = vmatpush.msra.mxu0 %v756_v25  ;;  %924 = vmatpush.msra.mxu3 %v825_v28  ;;  %v770_v25 = vld [vmem:[#allocation7 + $0x590] sm:$0xff] }
  0xa9   : > { %885 = vmatpush.msra.mxu1 %v820_v30  ;;  %906 = vmatpush.msra.mxu2 %v753_v31  ;;  %v766_v30 = vld [vmem:[#allocation7 + $0x570] sm:$0xff] }
  0xaa   : > { %866 = vmatpush.msra.mxu0 %v752_v29  ;;  %925 = vmatpush.msra.mxu3 %v821_v32  ;;  %v839_v29 = vld [vmem:[#allocation7 + $0x7b8] sm:$0xff]  ;;  %v834_v31 = vld [vmem:[#allocation7 + $0x790] sm:$0xff] }
  0xab   : > { %886 = vmatpush.msra.mxu1 %v816_v34  ;;  %907 = vmatpush.msra.mxu2 %v749_v35  ;;  %v767_v32 = vld [vmem:[#allocation7 + $0x578] sm:$0xff] }
  0xac   : > { %867 = vmatpush.msra.mxu0 %v748_v33  ;;  %926 = vmatpush.msra.mxu3 %v817_v36  ;;  %v835_v34 = vld [vmem:[#allocation7 + $0x798] sm:$0xff]  ;;  %v762_v36 = vld [vmem:[#allocation7 + $0x550] sm:$0xff] }
  0xad   : > { %887 = vmatpush.msra.mxu1 %v812_v38  ;;  %908 = vmatpush.msra.mxu2 %v745_v39  ;;  %v763_v38 = vld [vmem:[#allocation7 + $0x558] sm:$0xff] }
  0xae   : > { %868 = vmatpush.msra.mxu0 %v744_v37  ;;  %927 = vmatpush.msra.mxu3 %v813_v40  ;;  %v830_v37 = vld [vmem:[#allocation7 + $0x770] sm:$0xff]  ;;  %v831_v40 = vld [vmem:[#allocation7 + $0x778] sm:$0xff] }
  0xaf   : > { %888 = vmatpush.msra.mxu1 %v808_v42  ;;  %909 = vmatpush.msra.mxu2 %v741_v43  ;;  %v826_v42 = vld [vmem:[#allocation7 + $0x750] sm:$0xff]  ;;  %v759_v43 = vld [vmem:[#allocation7 + $0x538] sm:$0xff] }
  0xb0   : > { %869 = vmatpush.msra.mxu0 %v740_v41  ;;  %928 = vmatpush.msra.mxu3 %v809_v45  ;;  %v758_v41 = vld [vmem:[#allocation7 + $0x530] sm:$0xff]  ;;  %v827_v45 = vld [vmem:[#allocation7 + $0x758] sm:$0xff] }
  0xb1   : > { %889 = vmatpush.msra.mxu1 %v804_v47  ;;  %910 = vmatpush.msra.mxu2 %v737_v48  ;;  %v822_v47 = vld [vmem:[#allocation7 + $0x730] sm:$0xff]  ;;  %v755_v48 = vld [vmem:[#allocation7 + $0x518] sm:$0xff] }
  0xb2   : > { %870 = vmatpush.msra.mxu0 %v736_v46  ;;  %929 = vmatpush.msra.mxu3 %v805_v49  ;;  %v754_v46 = vld [vmem:[#allocation7 + $0x510] sm:$0xff]  ;;  %v823_v49 = vld [vmem:[#allocation7 + $0x738] sm:$0xff] }
  0xb3   : > { %890 = vmatpush.msra.mxu1 %v800_v51  ;;  %911 = vmatpush.msra.mxu2 %v733_v52  ;;  %v818_v51 = vld [vmem:[#allocation7 + $0x710] sm:$0xff]  ;;  %v751_v52 = vld [vmem:[#allocation7 + $0x4f8] sm:$0xff] }
  0xb4   : > { %871 = vmatpush.msra.mxu0 %v732_v50  ;;  %930 = vmatpush.msra.mxu3 %v801_v54  ;;  %v750_v50 = vld [vmem:[#allocation7 + $0x4f0] sm:$0xff]  ;;  %v819_v54 = vld [vmem:[#allocation7 + $0x718] sm:$0xff] }
  0xb5   : > { %891 = vmatpush.msra.mxu1 %v796_v56  ;;  %912 = vmatpush.msra.mxu2 %v729_v57  ;;  %v746_v56 = vld [vmem:[#allocation7 + $0x4d0] sm:$0xff] }
  0xb6   : > { %872 = vmatpush.msra.mxu0 %v728_v55  ;;  %931 = vmatpush.msra.mxu3 %v797_v58  ;;  %v814_v57 = vld [vmem:[#allocation7 + $0x6f0] sm:$0xff]  ;;  %v747_v58 = vld [vmem:[#allocation7 + $0x4d8] sm:$0xff] }
  0xb7   : > { %892 = vmatpush.msra.mxu1 %v792_v61  ;;  %913 = vmatpush.msra.mxu2 %v725_v63  ;;  %v742_v61 = vld [vmem:[#allocation7 + $0x4b0] sm:$0xff] }
  0xb8   : > { %873 = vmatpush.msra.mxu0 %v724_v60  ;;  %932 = vmatpush.msra.mxu3 %v793_v1  ;;  %v815_v60 = vld [vmem:[#allocation7 + $0x6f8] sm:$0xff]  ;;  %v810_v63 = vld [vmem:[#allocation7 + $0x6d0] sm:$0xff] }
  0xb9   : > { %893 = vmatpush.msra.mxu1 %v788_v5  ;;  %914 = vmatpush.msra.mxu2 %v721_v6  ;;  %v806_v5 = vld [vmem:[#allocation7 + $0x6b0] sm:$0xff]  ;;  %v739_v6 = vld [vmem:[#allocation7 + $0x498] sm:$0xff] }
  0xba   : > { %874 = vmatpush.msra.mxu0 %v720_v4  ;;  %933 = vmatpush.msra.mxu3 %v789_v9  ;;  %v738_v4 = vld [vmem:[#allocation7 + $0x490] sm:$0xff] }
  0xbb   : > { %979 = vmatpush.msrb.mxu2 %v783_v11  ;;  %894 = vmatpush.msra.mxu1 %v784_v12  ;;  %v802_v9 = vld [vmem:[#allocation7 + $0x690] sm:$0xff]  ;;  %v803_v12 = vld [vmem:[#allocation7 + $0x698] sm:$0xff] }
  0xbc   : > { %939 = vmatpush.msrb.mxu0 %v782_v10  ;;  %934 = vmatpush.msra.mxu3 %v785_v62  ;;  %v735_v10 = vld [vmem:[#allocation7 + $0x478] sm:$0xff] }
  0xbd   : > { %959 = vmatpush.msrb.mxu1 %v846_v15  ;;  %980 = vmatpush.msrb.mxu2 %v779_v16  ;;  %v2110_v62 = vld [vmem:[%s2063_s17 + $0x8] sm:$0xff]  ;;  %v798_v15 = vld [vmem:[#allocation7 + $0x670] sm:$0xff] }
  0xbe   : > { %940 = vmatpush.msrb.mxu0 %v778_v13  ;;  %999 = vmatpush.msrb.mxu3 %v847_v17  ;;  %v731_v16 = vld [vmem:[#allocation7 + $0x458] sm:$0xff] }
  0xbf   : > { %960 = vmatpush.msrb.mxu1 %v842_v21  ;;  %981 = vmatpush.msrb.mxu2 %v775_v22  ;;  %v799_v17 = vld [vmem:[#allocation7 + $0x678] sm:$0xff] }
  0xc0   : > { %941 = vmatpush.msrb.mxu0 %v774_v20  ;;  %1000 = vmatpush.msrb.mxu3 %v843_v23  ;;  %v794_v20 = vld [vmem:[#allocation7 + $0x650] sm:$0xff]  ;;  %v727_v22 = vld [vmem:[#allocation7 + $0x438] sm:$0xff] }
  0xc1   : > { %961 = vmatpush.msrb.mxu1 %v838_v26  ;;  %982 = vmatpush.msrb.mxu2 %v771_v27  ;;  %v795_v23 = vld [vmem:[#allocation7 + $0x658] sm:$0xff]  ;;  %v506_v26 = vperm.slane %v2095_v44, 2 }
  0xc2   : > { %942 = vmatpush.msrb.mxu0 %v770_v25  ;;  %1001 = vmatpush.msrb.mxu3 %v839_v29  ;;  %v790_v25 = vld [vmem:[#allocation7 + $0x630] sm:$0xff]  ;;  %v723_v27 = vld [vmem:[#allocation7 + $0x418] sm:$0xff] }
  0xc3   : > { %962 = vmatpush.msrb.mxu1 %v834_v31  ;;  %983 = vmatpush.msrb.mxu2 %v767_v32  ;;  %v786_v31 = vld [vmem:[#allocation7 + $0x610] sm:$0xff] }
  0xc4   : > { %943 = vmatpush.msrb.mxu0 %v766_v30  ;;  %1002 = vmatpush.msrb.mxu3 %v835_v34  ;;  %v507_v30 = vperm.slane %v2095_v44, 3  ;;  %v787_v34 = vld [vmem:[#allocation7 + $0x618] sm:$0xff] }
  0xc5   : > { %963 = vmatpush.msrb.mxu1 %v830_v37  ;;  %984 = vmatpush.msrb.mxu2 %v763_v38 }
  0xc6   : > { %944 = vmatpush.msrb.mxu0 %v762_v36  ;;  %1003 = vmatpush.msrb.mxu3 %v831_v40 }
  0xc7   : > { %964 = vmatpush.msrb.mxu1 %v826_v42  ;;  %985 = vmatpush.msrb.mxu2 %v759_v43 }
  0xc8   : > { %945 = vmatpush.msrb.mxu0 %v758_v41  ;;  %1004 = vmatpush.msrb.mxu3 %v827_v45 }
  0xc9   : > { %965 = vmatpush.msrb.mxu1 %v822_v47  ;;  %986 = vmatpush.msrb.mxu2 %v755_v48 }
  0xca   : > { %946 = vmatpush.msrb.mxu0 %v754_v46  ;;  %1005 = vmatpush.msrb.mxu3 %v823_v49 }
  0xcb   : > { %966 = vmatpush.msrb.mxu1 %v818_v51  ;;  %987 = vmatpush.msrb.mxu2 %v751_v52 }
  0xcc   : > { %947 = vmatpush.msrb.mxu0 %v750_v50  ;;  %1006 = vmatpush.msrb.mxu3 %v819_v54 }
  0xcd   : > { %967 = vmatpush.msrb.mxu1 %v814_v57  ;;  %988 = vmatpush.msrb.mxu2 %v747_v58 }
  0xce   : > { %948 = vmatpush.msrb.mxu0 %v746_v56  ;;  %1007 = vmatpush.msrb.mxu3 %v815_v60 }
  0xcf   : > { %968 = vmatpush.msrb.mxu1 %v810_v63  ;;  %935 = vmatmul.f32.vlgmr.msra.gmra.mxu3 %v2110_v62  ;;  %v1213_v63 = vld [vmem:[#allocation10 + $0x1f8] sm:$0xff] }
  0xd0   : > { %949 = vmatpush.msrb.mxu0 %v742_v61  ;;  %895 = vmatmul.f32.vlgmr.msra.gmra.mxu1 %v2110_v62 }
  0xd1   : > { %969 = vmatpush.msrb.mxu1 %v806_v5  ;;  %v1210_v5 = vld [vmem:[#allocation10 + $0x1e0] sm:$0xff] }
  0xd2   : > { %950 = vmatpush.msrb.mxu0 %v738_v4  ;;  %v1211_v4 = vld [vmem:[#allocation10 + $0x1e8] sm:$0xff] }
  0xd3   : > { %970 = vmatpush.msrb.mxu1 %v802_v9  ;;  %v1074_v9 = vld [vmem:[#allocation10 + $0x50] sm:$0xff] }
  0xd5   : > { %971 = vmatpush.msrb.mxu1 %v798_v15  ;;  %v1206_v15 = vld [vmem:[#allocation10 + $0x1c0] sm:$0xff] }
  0xd7   : > { %972 = vmatpush.msrb.mxu1 %v794_v20 }
  0xd9   : > { %973 = vmatpush.msrb.mxu1 %v790_v25  ;;  %v1069_v25 = vld [vmem:[#allocation10 + $0x28] sm:$0xff] }
  0xdb   : > { %974 = vmatpush.msrb.mxu1 %v786_v31 }
  0xdc   : > { %975 = vmatmul.f32.vlgmr.msrb.gmra.mxu1 %v2110_v62 }
  0xf4   : > { %v529_v59 = vpop.f32.mrf.mxu0 }
  0xf5   : > { %v530_v0 = vadd.f32 %v529_v59, %v504_v53 }
  0xf6   : > { %v549_v3 = vpop.f32.mrf.mxu1 }
  0xf7   : > { %v550_v7 = vadd.f32 %v549_v3, %v530_v0  ;;  %v743_v0 = vld [vmem:[#allocation7 + $0x4b8] sm:$0xff] }
  0xf8   : > { %v811_v3 = vld [vmem:[#allocation7 + $0x6d8] sm:$0xff]  ;;  %989 = vmatpush.msrb.mxu2 %v743_v0 }
  0xf9   : > { %v1452_v14 = vmul.f32 -1.442695, %v550_v7  ;;  %v807_v7 = vld [vmem:[#allocation7 + $0x6b8] sm:$0xff]  ;;  %1008 = vmatpush.msrb.mxu3 %v811_v3  ;;  %v1077_v3 = vld [vmem:[#allocation10 + $0x68] sm:$0xff] }
  0xfa   : > { %v569_v18 = vpop.f32.mrf.mxu2  ;;  %990 = vmatpush.msrb.mxu2 %v739_v6  ;;  %v1078_v0 = vld [vmem:[#allocation10 + $0x70] sm:$0xff]  ;;  %v1075_v6 = vld [vmem:[#allocation10 + $0x58] sm:$0xff] }
  0xfb   : > { %1570 = vpow2.f32 %v1452_v14  ;;  %v570_v19 = vadd.f32 %v569_v18, %v505_v8  ;;  %v734_v8 = vld [vmem:[#allocation7 + $0x470] sm:$0xff]  ;;  %1009 = vmatpush.msrb.mxu3 %v807_v7  ;;  %v1209_v7 = vld [vmem:[#allocation10 + $0x1d8] sm:$0xff] }
  0xfc   : > { %951 = vmatpush.msrb.mxu0 %v734_v8  ;;  %v730_v14 = vld [vmem:[#allocation7 + $0x450] sm:$0xff]  ;;  %991 = vmatpush.msrb.mxu2 %v735_v10  ;;  %v2141_v8 = vld [vmem:[#allocation8 + $0x1] ss:$2 sm:$0xf]  ;;  %v1208_v10 = vld [vmem:[#allocation10 + $0x1d0] sm:$0xff] }
  0xfd   : > { %v589_v24 = vpop.f32.mrf.mxu3  ;;  %1010 = vmatpush.msrb.mxu3 %v803_v12  ;;  %v1207_v12 = vld [vmem:[#allocation10 + $0x1c8] sm:$0xff] }
  0xfe   : > { %v590_v28 = vadd.f32 %v589_v24, %v570_v19  ;;  %v726_v19 = vld [vmem:[#allocation7 + $0x430] sm:$0xff]  ;;  %952 = vmatpush.msrb.mxu0 %v730_v14  ;;  %992 = vmatpush.msrb.mxu2 %v731_v16  ;;  %v1072_v14 = vld [vmem:[#allocation10 + $0x40] sm:$0xff] }
  0xff   : > { %1011 = vmatpush.msrb.mxu3 %v799_v17  ;;  %v722_v24 = vld [vmem:[#allocation7 + $0x410] sm:$0xff] }
 0x100   : > { %v1453_v33 = vmul.f32 -1.442695, %v590_v28  ;;  %953 = vmatpush.msrb.mxu0 %v726_v19  ;;  %v791_v28 = vld [vmem:[#allocation7 + $0x638] sm:$0xff]  ;;  %993 = vmatpush.msrb.mxu2 %v727_v22  ;;  %v1205_v19 = vld [vmem:[#allocation10 + $0x1b8] sm:$0xff] }
 0x101   : > { %v1571_v35 = vpop.eup %1570  ;;  %1012 = vmatpush.msrb.mxu3 %v795_v23  ;;  %v1204_v22 = vld [vmem:[#allocation10 + $0x1b0] sm:$0xff] }
 0x102   : > { %v2099_v39 = vadd.f32 1.0, %v1571_v35  ;;  %1572 = vpow2.f32 %v1453_v33  ;;  %954 = vmatpush.msrb.mxu0 %v722_v24  ;;  %994 = vmatpush.msrb.mxu2 %v723_v27  ;;  %v852_v24 = vperm.slane %v2141_v8, 1 }
 0x103   : > { %1013 = vmatpush.msrb.mxu3 %v791_v28  ;;  %v1068_v28 = vld [vmem:[#allocation10 + $0x20] sm:$0xff] }
 0x104   : > { %1574 = vrcp.f32 %v2099_v39  ;;  %vm681_vm0 = vweird.f32 %v2099_v39  ;;  %v687_v35 = vand.u32 2147483648, %v2099_v39  ;;  %v685_v44 = vand.u32 2147483647, %v2099_v39 }
 0x105   : > { %1014 = vmatpush.msrb.mxu3 %v787_v34 }
 0x106   : > { %1015 = vmatmul.f32.vlgmr.msrb.gmra.mxu3 %v2110_v62  ;;  %v688_v45 = vor.u32 1.1754944e-38, %v687_v35  ;;  %vm686_vm5 = vcmp.eq.f32.partialorder %v685_v44, 8.507059e+37  ;;  %v1066_v35 = vld [vmem:[#allocation10 + $0x10] sm:$0xff]  ;;  %v1065_v44 = vld [vmem:[#allocation10 + $0x8] sm:$0xff] }
 0x107   : > { %1216 = vmatpush.msra.mxu3 %v1213_v63  ;;  %v1114_v63 = vld [vmem:[#allocation10 + $0xd0] sm:$0xff] }
 0x108   : > { %v1573_v53 = vpop.eup %1572 }
 0x109   : > { %v2102_v55 = vadd.f32 1.0, %v1573_v53 }
 0x10a   : > { %v2104_v59 = vpop.eup %1574 }
 0x10b   : > { %1576 = vrcp.f32 %v2102_v55  ;;  %v677_v1 = vmul.f32 %v2104_v59, %v2099_v39  ;;  %vm682_vm1 = vweird.f32 %v2104_v59  ;;  %vm700_vm3 = vweird.f32 %v2102_v55 }
 0x10c   : > { %vm683_vm2 = vmor %vm681_vm0, %vm682_vm1  ;;  %v706_v39 = vand.u32 2147483648, %v2102_v55  ;;  %v704_v50 = vand.u32 2147483647, %v2102_v55 }
 0x10d   : > { %v678_v11 = vsub.f32 1.0, %v677_v1  ;;  %v1212_v1 = vld [vmem:[#allocation10 + $0x1f0] sm:$0xff] }
 0x10e   : > { %v707_v52 = vor.u32 1.1754944e-38, %v706_v39  ;;  %vm705_vm7 = vcmp.eq.f32.partialorder %v704_v50, 8.507059e+37  ;;  %1217 = vmatpush.msra.mxu3 %v1212_v1  ;;  %v1119_v39 = vld [vmem:[#allocation10 + $0xf8] sm:$0xff] }
 0x10f   : > { %v679_v21 = vmul.f32 %v2104_v59, %v678_v11  ;;  %v1073_v11 = vld [vmem:[#allocation10 + $0x48] sm:$0xff]  ;;  %1122 = vmatpush.msra.mxu1 %v1119_v39 }
 0x110   : > { %1218 = vmatpush.msra.mxu3 %v1211_v4  ;;  %v1243_v39 = vld [vmem:[#allocation10 + $0x228] sm:$0xff] }
 0x111   : > { %v2112_v13 = vpop.eup %1576  ;;  %v680_v33 = vadd.f32 %v2104_v59, %v679_v21  ;;  %v1070_v21 = vld [vmem:[#allocation10 + $0x30] sm:$0xff] }
 0x112   : > { %v696_v18 = vmul.f32 %v2112_v13, %v2102_v55  ;;  %vm701_vm4 = vweird.f32 %v2112_v13  ;;  %v1079_v55 = vld [vmem:[#allocation10 + $0x78] sm:$0xff]  ;;  %1219 = vmatpush.msra.mxu3 %v1210_v5 }
 0x113   : > { %v684_v42 = vsel %vm683_vm2, %v2104_v59, %v680_v33  ;;  %vm702_vm6 = vmor %vm700_vm3, %vm701_vm4  ;;  %v1201_v33 = vld [vmem:[#allocation10 + $0x198] sm:$0xff] }
 0x114   : > { %v697_v29 = vsub.f32 1.0, %v696_v18  ;;  %v689_v48 = vsel %vm686_vm5, %v688_v45, %v684_v42  ;;  %1220 = vmatpush.msra.mxu3 %v1209_v7  ;;  %v1071_v18 = vld [vmem:[#allocation10 + $0x38] sm:$0xff]  ;;  %v1198_v42 = vld [vmem:[#allocation10 + $0x180] sm:$0xff] }
 0x116   : > { %v698_v38 = vmul.f32 %v2112_v13, %v697_v29  ;;  %1221 = vmatpush.msra.mxu3 %v1208_v10  ;;  %v1202_v29 = vld [vmem:[#allocation10 + $0x1a0] sm:$0xff] }
 0x118   : > { %v609_v32 = vpop.f32.mrf.mxu0  ;;  %v699_v49 = vadd.f32 %v2112_v13, %v698_v38  ;;  %1222 = vmatpush.msra.mxu3 %v1207_v12  ;;  %v1199_v38 = vld [vmem:[#allocation10 + $0x188] sm:$0xff]  ;;  %v1112_v12 = vld [vmem:[#allocation10 + $0xc0] sm:$0xff] }
 0x119   : > { %v610_v37 = vadd.f32 %v609_v32, %v506_v26  ;;  %v629_v41 = vpop.f32.mrf.mxu1  ;;  %v1203_v26 = vld [vmem:[#allocation10 + $0x1a8] sm:$0xff]  ;;  %v1067_v32 = vld [vmem:[#allocation10 + $0x18] sm:$0xff] }
 0x11a   : > { %v649_v36 = vpop.f32.mrf.mxu2  ;;  %v703_v54 = vsel %vm702_vm6, %v2112_v13, %v699_v49  ;;  %v851_v13 = vperm.slane %v2141_v8, 0  ;;  %1223 = vmatpush.msra.mxu3 %v1206_v15  ;;  %v1252_v49 = vld [vmem:[#allocation10 + $0x270] sm:$0xff] }
 0x11b   : > { %v650_v40 = vadd.f32 %v649_v36, %v507_v30  ;;  %v630_v47 = vadd.f32 %v629_v41, %v610_v37  ;;  %v708_v56 = vsel %vm705_vm7, %v707_v52, %v703_v54  ;;  %v1200_v36 = vld [vmem:[#allocation10 + $0x190] sm:$0xff]  ;;  %v1064_v41 = vld [vmem:[#allocation10] sm:$0xff] }
 0x11c   : > { %v713_v57 = vsub.f32 1.0, %v708_v56  ;;  %v715_v60 = vmul.f32 %v708_v56, %v2085_v2  ;;  %v1076_v2 = vld [vmem:[#allocation10 + $0x60] sm:$0xff]  ;;  %1224 = vmatpush.msra.mxu3 %v1205_v19 }
 0x11d   : > { %v669_v43 = vpop.f32.mrf.mxu3  ;;  %v1250_v54 = vld [vmem:[#allocation10 + $0x260] sm:$0xff] }
 0x11e   : > { %v670_v46 = vadd.f32 %v669_v43, %v650_v40  ;;  %1225 = vmatpush.msra.mxu3 %v1204_v22  ;;  %v1245_v22 = vld [vmem:[#allocation10 + $0x238] sm:$0xff] }
 0x120   : > { %v710_v51 = vmul.f32 %v689_v48, %v670_v46  ;;  %1226 = vmatpush.msra.mxu3 %v1203_v26  ;;  %v1118_v46 = vld [vmem:[#allocation10 + $0xf0] sm:$0xff]  ;;  %v1117_v48 = vld [vmem:[#allocation10 + $0xe8] sm:$0xff] }
 0x121   : > { %1123 = vmatpush.msra.mxu1 %v1118_v46  ;;  %v1105_v46 = vld [vmem:[#allocation10 + $0x88] sm:$0xff] }
 0x122   : > { %v711_v53 = vadd.f32 %v710_v51, %v630_v47  ;;  %1227 = vmatpush.msra.mxu3 %v1202_v29  ;;  %v1253_v47 = vld [vmem:[#allocation10 + $0x278] sm:$0xff]  ;;  %v1251_v51 = vld [vmem:[#allocation10 + $0x268] sm:$0xff]  ;;  %v1244_v29 = vld [vmem:[#allocation10 + $0x230] sm:$0xff] }
 0x123   : > { %1124 = vmatpush.msra.mxu1 %v1117_v48  ;;  %v1104_v48 = vld [vmem:[#allocation10 + $0x80] sm:$0xff] }
 0x124   : > { %1578 = vtanh.f32 %v711_v53  ;;  %1228 = vmatpush.msra.mxu3 %v1201_v33  ;;  %v1116_v53 = vld [vmem:[#allocation10 + $0xe0] sm:$0xff] }
 0x125   : > { %1125 = vmatpush.msra.mxu1 %v1116_v53  ;;  %v1158_v53 = vld [vmem:[#allocation10 + $0x170] sm:$0xff] }
 0x126   : > { %1229 = vmatpush.msra.mxu3 %v1200_v36 }
 0x128   : > { %1230 = vmatpush.msra.mxu3 %v1199_v38 }
 0x12a   : > { %v1579_v58 = vpop.eup %1578  ;;  %1231 = vmatpush.msra.mxu3 %v1198_v42 }
 0x12b   : > { %v714_v59 = vmul.f32 %v1579_v58, %v713_v57  ;;  %v1115_v57 = vld [vmem:[#allocation10 + $0xd8] sm:$0xff]  ;;  %v854_v58 = vperm.slane %v2141_v8, 3 }
 0x12c   : > { %1126 = vmatpush.msra.mxu1 %v1115_v57  ;;  %v1155_v57 = vld [vmem:[#allocation10 + $0x158] sm:$0xff] }
 0x12d   : > { %v716_v61 = vadd.f32 %v715_v60, %v714_v59  ;;  %v1249_v60 = vld [vmem:[#allocation10 + $0x258] sm:$0xff] }
 0x12e   : > { %1127 = vmatpush.msra.mxu1 %v1114_v63  ;;  %v1565_v63 = vld [vmem:[#allocation11] ss:$0 sm:$0xff] }
 0x12f   : > { %875 = vmatmul.f32.vlgmr.msra.gmra.mxu0 %v716_v61  ;;  %915 = vmatmul.f32.vlgmr.msra.gmra.mxu2 %v716_v61  ;;  %1459 = vst [vmem:[%s2138_s16 + $0x18] sm:$0xff] %v716_v61 }
 0x130   : > { %1082 = vmatpush.msra.mxu0 %v1079_v55 }
 0x132   : > { %1083 = vmatpush.msra.mxu0 %v1078_v0 }
 0x134   : > { %1084 = vmatpush.msra.mxu0 %v1077_v3  ;;  %v1248_v3 = vld [vmem:[#allocation10 + $0x250] sm:$0xff] }
 0x136   : > { %1085 = vmatpush.msra.mxu0 %v1076_v2  ;;  %v1113_v2 = vld [vmem:[#allocation10 + $0xc8] sm:$0xff] }
 0x137   : > { %955 = vmatmul.f32.vlgmr.msrb.gmra.mxu0 %v716_v61  ;;  %995 = vmatmul.f32.vlgmr.msrb.gmra.mxu2 %v716_v61  ;;  %v853_v61 = vperm.slane %v2141_v8, 2 }
 0x138   : > { %1086 = vmatpush.msra.mxu0 %v1075_v6  ;;  %1128 = vmatpush.msra.mxu1 %v1113_v2  ;;  %v1147_v2 = vld [vmem:[#allocation10 + $0x118] sm:$0xff] }
 0x13a   : > { %1087 = vmatpush.msra.mxu0 %v1074_v9  ;;  %v1247_v9 = vld [vmem:[#allocation10 + $0x248] sm:$0xff]  ;;  %1129 = vmatpush.msra.mxu1 %v1112_v12  ;;  %v1144_v12 = vld [vmem:[#allocation10 + $0x100] sm:$0xff] }
 0x13c   : > { %1088 = vmatpush.msra.mxu0 %v1073_v11 }
 0x13e   : > { %1089 = vmatpush.msra.mxu0 %v1072_v14 }
 0x140   : > { %1090 = vmatpush.msra.mxu0 %v1071_v18  ;;  %v1111_v18 = vld [vmem:[#allocation10 + $0xb8] sm:$0xff] }
 0x141   : > { %1130 = vmatpush.msra.mxu1 %v1111_v18 }
 0x142   : > { %1091 = vmatpush.msra.mxu0 %v1070_v21 }
 0x144   : > { %1092 = vmatpush.msra.mxu0 %v1069_v25  ;;  %v1110_v25 = vld [vmem:[#allocation10 + $0xb0] sm:$0xff] }
 0x145   : > { %1131 = vmatpush.msra.mxu1 %v1110_v25 }
 0x146   : > { %1093 = vmatpush.msra.mxu0 %v1068_v28 }
 0x148   : > { %1094 = vmatpush.msra.mxu0 %v1067_v32 }
 0x14a   : > { %1095 = vmatpush.msra.mxu0 %v1066_v35 }
 0x14c   : > { %1096 = vmatpush.msra.mxu0 %v1065_v44 }
 0x14d   : > { %v896_v17 = vpop.f32.mrf.mxu1 }
 0x14e   : > { %1097 = vmatpush.msra.mxu0 %v1064_v41 }
 0x150   : > { %1256 = vmatpush.msrb.mxu0 %v1253_v47  ;;  %v1242_v47 = vld [vmem:[#allocation10 + $0x220] sm:$0xff] }
 0x152   : > { %v936_v31 = vpop.f32.mrf.mxu3  ;;  %1257 = vmatpush.msrb.mxu0 %v1252_v49  ;;  %v1241_v49 = vld [vmem:[#allocation10 + $0x218] sm:$0xff] }
 0x154   : > { %1258 = vmatpush.msrb.mxu0 %v1251_v51  ;;  %v1239_v51 = vld [vmem:[#allocation10 + $0x208] sm:$0xff] }
 0x156   : > { %1259 = vmatpush.msrb.mxu0 %v1250_v54  ;;  %v1157_v54 = vld [vmem:[#allocation10 + $0x168] sm:$0xff] }
 0x158   : > { %1260 = vmatpush.msrb.mxu0 %v1249_v60  ;;  %v1152_v60 = vld [vmem:[#allocation10 + $0x140] sm:$0xff] }
 0x159   : > { %v976_v14 = vpop.f32.mrf.mxu1 }
 0x15a   : > { %1261 = vmatpush.msrb.mxu0 %v1248_v3 }
 0x15c   : > { %1262 = vmatpush.msrb.mxu0 %v1247_v9 }
 0x189   : > { %v1016_v11 = vpop.f32.mrf.mxu3 }
 0x1ac   : > { %v876_v16 = vpop.f32.mrf.mxu0 }
 0x1ad   : > { %v877_v20 = vadd.f32 %v876_v16, %v851_v13  ;;  %v1246_v16 = vld [vmem:[#allocation10 + $0x240] sm:$0xff] }
 0x1ae   : > { %1263 = vmatpush.msrb.mxu0 %v1246_v16 }
 0x1af   : > { %v897_v23 = vadd.f32 %v896_v17, %v877_v20 }
 0x1b0   : > { %1264 = vmatpush.msrb.mxu0 %v1245_v22 }
 0x1b1   : > { %v1455_v27 = vmul.f32 -1.442695, %v897_v23 }
 0x1b2   : > { %v916_v30 = vpop.f32.mrf.mxu2  ;;  %1265 = vmatpush.msrb.mxu0 %v1244_v29 }
 0x1b3   : > { %1580 = vpow2.f32 %v1455_v27  ;;  %v917_v34 = vadd.f32 %v916_v30, %v852_v24 }
 0x1b4   : > { %v956_v0 = vpop.f32.mrf.mxu0  ;;  %1266 = vmatpush.msrb.mxu0 %v1243_v39 }
 0x1b5   : > { %v937_v37 = vadd.f32 %v936_v31, %v917_v34  ;;  %v957_v8 = vadd.f32 %v956_v0, %v853_v61  ;;  %v1109_v31 = vld [vmem:[#allocation10 + $0xa8] sm:$0xff]  ;;  %v1108_v34 = vld [vmem:[#allocation10 + $0xa0] sm:$0xff]  ;;  %v1151_v61 = vld [vmem:[#allocation10 + $0x138] sm:$0xff] }
 0x1b6   : > { %1132 = vmatpush.msra.mxu1 %v1109_v31  ;;  %1267 = vmatpush.msrb.mxu0 %v1242_v47  ;;  %v1149_v0 = vld [vmem:[#allocation10 + $0x128] sm:$0xff] }
 0x1b7   : > { %v1456_v40 = vmul.f32 -1.442695, %v937_v37  ;;  %v977_v23 = vadd.f32 %v976_v14, %v957_v8  ;;  %v1107_v37 = vld [vmem:[#allocation10 + $0x98] sm:$0xff]  ;;  %v1146_v8 = vld [vmem:[#allocation10 + $0x110] sm:$0xff] }
 0x1b8   : > { %1133 = vmatpush.msra.mxu1 %v1108_v34  ;;  %1268 = vmatpush.msrb.mxu0 %v1241_v49 }
 0x1b9   : > { %v1581_v43 = vpop.eup %1580  ;;  %1582 = vpow2.f32 %v1456_v40 }
 0x1ba   : > { %v2145_v45 = vadd.f32 1.0, %v1581_v43  ;;  %v996_v55 = vpop.f32.mrf.mxu2  ;;  %1134 = vmatpush.msra.mxu1 %v1107_v37 }
 0x1bb   : > { %v997_v5 = vadd.f32 %v996_v55, %v854_v58  ;;  %v1154_v58 = vld [vmem:[#allocation10 + $0x150] sm:$0xff] }
 0x1bc   : > { %1584 = vrcp.f32 %v2145_v45  ;;  %v1034_v4 = vand.u32 2147483648, %v2145_v45  ;;  %v1032_v7 = vand.u32 2147483647, %v2145_v45  ;;  %vm1028_vm9 = vweird.f32 %v2145_v45  ;;  %v1150_v55 = vld [vmem:[#allocation10 + $0x130] sm:$0xff] }
 0x1bd   : > { %v1017_v20 = vadd.f32 %v1016_v11, %v997_v5  ;;  %v1145_v11 = vld [vmem:[#allocation10 + $0x108] sm:$0xff] }
 0x1be   : > { %v1035_v17 = vor.u32 1.1754944e-38, %v1034_v4  ;;  %vm1033_vm11 = vcmp.eq.f32.partialorder %v1032_v7, 8.507059e+37 }
 0x1bf   : > { %v1583_v50 = vpop.eup %1582 }
 0x1c0   : > { %v2148_v52 = vadd.f32 1.0, %v1583_v50  ;;  %v1240_v50 = vld [vmem:[#allocation10 + $0x210] sm:$0xff] }
 0x1c1   : > { %1269 = vmatpush.msrb.mxu0 %v1240_v50 }
 0x1c2   : > { %v1585_v56 = vpop.eup %1584  ;;  %1586 = vrcp.f32 %v2148_v52  ;;  %v1053_v28 = vand.u32 2147483648, %v2148_v52  ;;  %v1051_v30 = vand.u32 2147483647, %v2148_v52  ;;  %vm1047_vm13 = vweird.f32 %v2148_v52 }
 0x1c3   : > { %v1024_v59 = vmul.f32 %v1585_v56, %v2145_v45  ;;  %vm1029_vm8 = vweird.f32 %v1585_v56  ;;  %v1106_v45 = vld [vmem:[#allocation10 + $0x90] sm:$0xff]  ;;  %1270 = vmatpush.msrb.mxu0 %v1239_v51 }
 0x1c4   : > { %vm1030_vm10 = vmor %vm1028_vm9, %vm1029_vm8  ;;  %v1054_v36 = vor.u32 1.1754944e-38, %v1053_v28  ;;  %vm1052_vm15 = vcmp.eq.f32.partialorder %v1051_v30, 8.507059e+37  ;;  %1135 = vmatpush.msra.mxu1 %v1106_v45 }
 0x1c5   : > { %v1025_v1 = vsub.f32 1.0, %v1024_v59  ;;  %v1153_v59 = vld [vmem:[#allocation10 + $0x148] sm:$0xff] }
 0x1c6   : > { %1136 = vmatpush.msra.mxu1 %v1105_v46 }
 0x1c7   : > { %v1026_v6 = vmul.f32 %v1585_v56, %v1025_v1  ;;  %v1148_v1 = vld [vmem:[#allocation10 + $0x120] sm:$0xff] }
 0x1c8   : > { %v1587_v10 = vpop.eup %1586  ;;  %1137 = vmatpush.msra.mxu1 %v1104_v48 }
 0x1c9   : > { %v1043_v13 = vmul.f32 %v1587_v10, %v2148_v52  ;;  %v1027_v15 = vadd.f32 %v1585_v56, %v1026_v6  ;;  %vm1048_vm12 = vweird.f32 %v1587_v10  ;;  %v1159_v52 = vld [vmem:[#allocation10 + $0x178] sm:$0xff]  ;;  %v1566_v6 = vld [vmem:[#allocation11 + $0x3] ss:$0 sm:$0xff] }
 0x1ca   : > { %vm1049_vm14 = vmor %vm1047_vm13, %vm1048_vm12  ;;  %1162 = vmatpush.msra.mxu2 %v1159_v52 }
 0x1cb   : > { %v1044_v19 = vsub.f32 1.0, %v1043_v13  ;;  %v1031_v21 = vsel %vm1030_vm10, %v1585_v56, %v1027_v15  ;;  %v1156_v56 = vld [vmem:[#allocation10 + $0x160] sm:$0xff] }
 0x1cc   : > { %v1036_v24 = vsel %vm1033_vm11, %v1035_v17, %v1031_v21  ;;  %1163 = vmatpush.msra.mxu2 %v1158_v53  ;;  %v1567_v13 = vld [vmem:[#allocation11 + $0x1] ss:$0 sm:$0xff]  ;;  %v1568_v17 = vld [vmem:[#allocation11 + $0x4] ss:$0 sm:$0xff]  ;;  %v1569_v21 = vld [vmem:[#allocation11 + $0x2] ss:$0 sm:$0xff] }
 0x1cd   : > { %v1045_v26 = vmul.f32 %v1587_v10, %v1044_v19  ;;  %v1057_v27 = vmul.f32 %v1036_v24, %v1017_v20  ;;  %v1183_v20 = vlaneseq }
 0x1ce   : > { %1164 = vmatpush.msra.mxu2 %v1157_v54 }
 0x1cf   : > { %v1058_v32 = vadd.f32 %v1057_v27, %v977_v23  ;;  %v1046_v33 = vadd.f32 %v1587_v10, %v1045_v26  ;;  %v1184_v22 = vand.u32 127, %v1183_v20 }
 0x1d0   : > { %1165 = vmatpush.msra.mxu2 %v1156_v56 }
 0x1d1   : > { %1588 = vtanh.f32 %v1058_v32  ;;  %v1050_v35 = vsel %vm1049_vm14, %v1587_v10, %v1046_v33  ;;  %vm1185_vm0 = vcmp.lt.s32.totalorder %v1184_v22, 8 }
 0x1d2   : > { %v1055_v44 = vsel %vm1052_vm15, %v1054_v36, %v1050_v35  ;;  %1166 = vmatpush.msra.mxu2 %v1155_v57 }
 0x1d3   : > { %v1060_v38 = vsub.f32 1.0, %v1055_v44  ;;  %v1062_v42 = vmul.f32 %v2110_v62, %v1055_v44  ;;  %v1238_v62 = vld [vmem:[#allocation10 + $0x200] sm:$0xff] }
 0x1d4   : > { %1271 = vmatpush.msrb.mxu0 %v1238_v62  ;;  %1167 = vmatpush.msra.mxu2 %v1154_v58 }
 0x1d6   : > { %1168 = vmatpush.msra.mxu2 %v1153_v59 }
 0x1d7   : > { %v1589_v40 = vpop.eup %1588 }
 0x1d8   : > { %v1061_v41 = vmul.f32 %v1589_v40, %v1060_v38  ;;  %1169 = vmatpush.msra.mxu2 %v1152_v60 }
 0x1da   : > { %v1063_v43 = vadd.f32 %v1062_v42, %v1061_v41  ;;  %1170 = vmatpush.msra.mxu2 %v1151_v61 }
 0x1dc   : > { %1098 = vmatmul.f32.vlgmr.msra.gmra.mxu0 %v1063_v43  ;;  %1460 = vst [vmem:[%s2138_s16 + $0x20] sm:$0xff] %v1063_v43  ;;  %1232 = vmatmul.f32.vlgmr.msra.gmra.mxu3 %v1063_v43 }
 0x1dd   : > { %1171 = vmatpush.msra.mxu2 %v1150_v55 }
 0x1df   : > { %1172 = vmatpush.msra.mxu2 %v1149_v0 }
 0x1e1   : > { %1173 = vmatpush.msra.mxu2 %v1148_v1 }
 0x1e3   : > { %1174 = vmatpush.msra.mxu2 %v1147_v2 }
 0x1e5   : > { %1175 = vmatpush.msra.mxu2 %v1146_v8 }
 0x1e7   : > { %1176 = vmatpush.msra.mxu2 %v1145_v11 }
 0x1e9   : > { %1177 = vmatpush.msra.mxu2 %v1144_v12 }
 0x259   : > { %v1099_v3 = vpop.f32.mrf.mxu0 }
 0x25a   : > { %v1100_v4 = vadd.f32 %v1565_v63, %v1099_v3 }
 0x25c   : > { %v1102_v5 = vmax.f32 %v1100_v4, 0.0 }
 0x25e   : > { %1138 = vmatmul.f32.vlgmr.msra.gmra.mxu1 %v1102_v5 }
 0x25f   : > { %v1233_v7 = vpop.f32.mrf.mxu3 }
 0x260   : > { %v1234_v9 = vadd.f32 %v1566_v6, %v1233_v7 }
 0x262   : > { %v1236_v10 = vmax.f32 %v1234_v9, 0.0 }
 0x264   : > { %1272 = vmatmul.f32.vlgmr.msrb.gmra.mxu0 %v1236_v10 }
 0x2db   : > { %v1139_v14 = vpop.f32.mrf.mxu1 }
 0x2dc   : > { %v1140_v15 = vadd.f32 %v1567_v13, %v1139_v14 }
 0x2de   : > { %v1142_v16 = vmax.f32 %v1140_v15, 0.0 }
 0x2e0   : > { %1178 = vmatmul.f32.vlgmr.msra.gmra.mxu2 %v1142_v16 }
 0x2e1   : > { %v1273_v18 = vpop.f32.mrf.mxu0 }
 0x2e2   : > { %v1274_v19 = vadd.f32 %v1568_v17, %v1273_v18 }
 0x2e4   : > { %1458 = vst [vmem:[%s2138_s16 + $0x10] sm:$0xff] %v1274_v19 }
 0x363   : > { %v1179_v23 = vpop.f32.mrf.mxu2 }
 0x364   : > { %v1180_v24 = vadd.f32 %v1569_v21, %v1179_v23 }
 0x366   : > { %v1182_v25 = vmax.f32 %v1180_v24, 0.0 }
 0x368   : > { %1276 = vst [vmem:[%s2138_s16] sm:$0xff] %v1182_v25  ;;  %v1186_v26 = vsel %vm1185_vm0, %v1182_v25, -1e+30 }
 0x369   : > { %1187 = vmax.xlane.f32.xlu0 %v1186_v26 }
 0x3dc   : > { %v1188_v27 = vpop.xlane.xlu0 %1187 }
 0x3dd   : > { %v1189_v28 = vsub.f32 %v1182_v25, %v1188_v27 }
 0x3df   : > { %v1190_v29 = vmul.f32 1.442695, %v1189_v28 }
 0x3e1   : > { %1590 = vpow2.f32 %v1190_v29 }
 0x3e7   : > { %v1591_v30 = vpop.eup %1590 }
 0x3e8   : > { %v1192_v31 = vsel %vm1185_vm0, %v1591_v30, 0.0 }
 0x3e9   : > { %1193 = vadd.xlane.f32.xlu0 %v1192_v31 }
 0x45c   : > { %v1194_v32 = vpop.xlane.xlu0 %1193 }
 0x45d   : > { %1592 = vrcp.f32 %v1194_v32 }
 0x463   : > { %v1593_v33 = vpop.eup %1592 }
 0x464   : > { %v1196_v34 = vmul.f32 %v1593_v33, %v1192_v31 }
 0x466   : > { %1457 = vst [vmem:[%s2138_s16 + $0x8] sm:$0xff] %v1196_v34 }
 0x467   : > { %1801 = shalt.err (!%p1798_p10)
}
 0x468   : > { %s1867_s9 = smov 128   ;;  %s1868_s15 = smov 256  }
 0x469   : > { %s1869_s2 = smov 8  }
 0x46a   : > { %1485 = dma.vmem_to_hbm [thread:$0]  (%p1997_p4), %s1298_s4, 640, %s1300_s3, %s1286_s27, %s1867_s9, %s1868_s15, %s1869_s2  }
 0x46b PF: > { %s1314_s17 = sand.u32 1, %s1844_s21   ;;  %p2227_p5 = scmp.ge.s32.totalorder %s1856_s24, 2 }
 0x46c   : > { %s1315_s11 = scalar_lea.sflag [#allocation4], %s1314_s17 }
 0x46d   : > { %p1508_p11 = pnand %p2227_p5, %p2001_p6 }
 0x46f   : > { %p1509_p13 = pneg %p1508_p11 }
 0x471   : > { %1839 = dma.done.wait (%p1509_p13), %s1315_s11, 640  }
 0x472   : > { %1841 = vsyncadd (%p1509_p13), %s1315_s11, 4294966656  ;;  %p24_p0 = scmp.ge.s32.totalorder %s1969_s12, 4   ;;  %s2228_s21 = smov %s1848_s22 }
 0x473   : > { %s2229_s22 = smov %s1852_s23  ;;  %s2230_s23 = smov %s1980_s14 }
 0x474   : > { %s2231_s24 = smov %s1969_s12  ;;  %26 = sbr.rel (!%p24_p0) target bundleno = 14 (0xe), region = 129 }
 0x479   :  { %1321 = vsyncpa [#allocation3], 1 }
 0x47a   :  { %1323 = vsyncpa [#allocation3 + $0x1], 1 }
 0x47b   :  { %1324 = vsyncpa [#allocation6], 1 }
 0x47c   :  { %1326 = vsyncpa [#allocation6 + $0x1], 1 }
 0x47d   :  { %1327 = vsyncpa [#allocation9], 1 }
 0x47e   :  { %1328 = vsyncpa [#allocation12], 1 }
 0x47f   :  { %1329 = vsyncpa [#allocation4], 1 }
 0x480   :  { %1331 = vsyncpa [#allocation4 + $0x1], 1 }

</bundles_post_ra>
